<compile_context>
chip_gen: v5e
topology: v5e:2x2
jax: 0.10.0
libtpu: 0.0.40
codegen_flags: <defaults>
</compile_context>

<pallas_src>
import functools

import jax
import jax.numpy as jnp
from jax.experimental import pallas as pl
from jax.experimental.pallas import tpu as pltpu


# Max tile sizes: tm>=512 sweet spot on M, tn=256 fills the 2x256x256 MXU on
# v6e/v7x (harmless on v5e), tk multiple of 128 keeps LHS lanes / RHS sublanes
# aligned.  Working set (bf16 in, f32 acc/out, double buffered) ~3 MiB.
_TM = 512
_TK = 512
_TN = 256
_VMEM_LIMIT = 32 * 1024 * 1024  # explicit; safe on v5e/v6e/v7x


def _round_up(x, m):
    return (x + m - 1) // m * m


def _pick_tiles(m, k, n):
    tm = min(_TM, _round_up(m, 8))      # sublane axis: multiple of 8
    tk = min(_TK, _round_up(k, 128))    # lane (LHS) / sublane (RHS) alignment
    tn = min(_TN, _round_up(n, 128))    # lane-dense output
    return tm, tk, tn


# ----------------------------------------------------------------------------
# Pallas kernels
# ----------------------------------------------------------------------------
def _conv_matmul_kernel(a_ref, w_ref, b_ref, y_ref, *rest,
                        leaky_slope, collect_stats, m_true, mask_rows):
    """Tiled matmul: y = a @ w + b with optional fused LeakyReLU epilogue or
    fused per-column (per-channel) batch-stat accumulation (sum, sum-of-sq).

    Grid = (N_tiles, M_tiles, K_tiles); K (reduction) innermost; f32 accumulator
    lives in VMEM scratch across the K axis; stats accumulate across the M axis.
    """
    if collect_stats:
        sum_ref, ssq_ref, acc_ref = rest
    else:
        (acc_ref,) = rest

    # Grid queries MUST happen at the top level of the kernel body (never
    # inside a pl.when / lax.cond branch); only their values are closed over.
    k = pl.program_id(2)
    m = pl.program_id(1)
    is_last_k = k == pl.num_programs(2) - 1

    @pl.when(k == 0)
    def _init():
        acc_ref[...] = jnp.zeros_like(acc_ref)

    # bf16 x bf16 -> f32 accumulate on the MXU.
    acc_ref[...] += jnp.dot(a_ref[...], w_ref[...],
                            preferred_element_type=jnp.float32)

    if collect_stats:
        @pl.when(jnp.logical_and(is_last_k, m == 0))
        def _zero_stats():
            sum_ref[...] = jnp.zeros_like(sum_ref)
            ssq_ref[...] = jnp.zeros_like(ssq_ref)

    @pl.when(is_last_k)
    def _finalize():
        y = acc_ref[...] + b_ref[...]
        if leaky_slope is not None:
            y = jnp.where(y > 0, y, leaky_slope * y)
        y_ref[...] = y.astype(y_ref.dtype)

        if collect_stats:
            tm = y_ref.shape[0]
            if mask_rows:
                # Mask out zero-padded rows (they would contribute `bias`).
                row = jax.lax.broadcasted_iota(jnp.int32, (tm, 1), 0) + m * tm
                ym = y * (row < m_true).astype(jnp.float32)
            else:
                ym = y
            sum_ref[...] += jnp.sum(ym, axis=0, keepdims=True)
            ssq_ref[...] += jnp.sum(ym * ym, axis=0, keepdims=True)


def _bn_apply_kernel(y_ref, sum_ref, ssq_ref, g_ref, beta_ref, o_ref,
                     *, m_true, eps, slope):
    """Training-mode BatchNorm (from precomputed sum / sum-of-sq) + LeakyReLU."""
    inv_m = 1.0 / m_true
    mean = sum_ref[...] * inv_m
    var = jnp.maximum(ssq_ref[...] * inv_m - mean * mean, 0.0)  # biased variance
    scale = jax.lax.rsqrt(var + eps) * g_ref[...]
    y = (y_ref[...] - mean) * scale + beta_ref[...]
    o_ref[...] = jnp.where(y > 0, y, slope * y).astype(o_ref.dtype)


# ----------------------------------------------------------------------------
# Kernel wrappers
# ----------------------------------------------------------------------------
def matmul_fused(a, w, b, *, leaky_slope=None, collect_stats=False):
    """Padded tiled matmul.  Returns y_p[Mp, Np] (and (sum, sumsq)[1, Np] if
    collect_stats).  Callers slice [:M, :N]."""
    M, K = a.shape
    K2, N = w.shape
    assert K == K2
    assert not (collect_stats and leaky_slope is not None)
    tm, tk, tn = _pick_tiles(M, K, N)
    Mp, Kp, Np = _round_up(M, tm), _round_up(K, tk), _round_up(N, tn)

    # bf16 MXU inputs; zero padding contributes nothing to the contraction.
    a_p = jnp.pad(a, ((0, Mp - M), (0, Kp - K))).astype(jnp.bfloat16)
    w_p = jnp.pad(w, ((0, Kp - K), (0, Np - N))).astype(jnp.bfloat16)
    b_p = jnp.pad(b.astype(jnp.float32).reshape(1, -1), ((0, 0), (0, Np - N)))

    grid = (Np // tn, Mp // tm, Kp // tk)  # reduction axis (K) innermost

    out_shape = [jax.ShapeDtypeStruct((Mp, Np), jnp.float32)]
    out_specs = [pl.BlockSpec((tm, tn), lambda n, m, k: (m, n))]
    if collect_stats:
        out_shape += [jax.ShapeDtypeStruct((1, Np), jnp.float32)] * 2
        out_specs += [pl.BlockSpec((1, tn), lambda n, m, k: (0, n)),
                      pl.BlockSpec((1, tn), lambda n, m, k: (0, n))]
        # Stats accumulate across the M axis -> M must be sequential.
        dims = ("parallel", "arbitrary", "arbitrary")
    else:
        dims = ("parallel", "parallel", "arbitrary")  # megacore over N and M

    kernel = functools.partial(_conv_matmul_kernel, leaky_slope=leaky_slope,
                               collect_stats=collect_stats, m_true=M,
                               mask_rows=(Mp != M))
    res = pl.pallas_call(
        kernel,
        grid=grid,
        in_specs=[
            pl.BlockSpec((tm, tk), lambda n, m, k: (m, k)),
            pl.BlockSpec((tk, tn), lambda n, m, k: (k, n)),
            pl.BlockSpec((1, tn), lambda n, m, k: (0, n)),
        ],
        out_specs=tuple(out_specs) if collect_stats else out_specs[0],
        out_shape=tuple(out_shape) if collect_stats else out_shape[0],
        scratch_shapes=[pltpu.VMEM((tm, tn), jnp.float32)],
        compiler_params=pltpu.CompilerParams(
            dimension_semantics=dims,
            vmem_limit_bytes=_VMEM_LIMIT,
        ),
    )(a_p, w_p, b_p)
    return res


def bn_lrelu_apply(y_p, s, ss, gamma, beta, *, m_true, eps=1e-5, slope=0.2):
    """Apply BN (stats from the fused conv epilogue) + LeakyReLU, tiled."""
    Mp, Np = y_p.shape
    tm, tn = min(_TM, Mp), min(_TN, Np)   # both divide (see matmul_fused padding)
    C = gamma.shape[0]
    g_p = jnp.pad(gamma.astype(jnp.float32).reshape(1, -1), ((0, 0), (0, Np - C)))
    be_p = jnp.pad(beta.astype(jnp.float32).reshape(1, -1), ((0, 0), (0, Np - C)))
    kernel = functools.partial(_bn_apply_kernel, m_true=m_true, eps=eps, slope=slope)
    return pl.pallas_call(
        kernel,
        grid=(Mp // tm, Np // tn),
        in_specs=[
            pl.BlockSpec((tm, tn), lambda i, j: (i, j)),
            pl.BlockSpec((1, tn), lambda i, j: (0, j)),
            pl.BlockSpec((1, tn), lambda i, j: (0, j)),
            pl.BlockSpec((1, tn), lambda i, j: (0, j)),
            pl.BlockSpec((1, tn), lambda i, j: (0, j)),
        ],
        out_specs=pl.BlockSpec((tm, tn), lambda i, j: (i, j)),
        out_shape=jax.ShapeDtypeStruct((Mp, Np), jnp.float32),
        compiler_params=pltpu.CompilerParams(
            dimension_semantics=("parallel", "parallel"),
            vmem_limit_bytes=_VMEM_LIMIT,
        ),
    )(y_p, s, ss, g_p, be_p)


# ----------------------------------------------------------------------------
# Glue (pure JAX): im2col patch extraction, layer plumbing, params
# ----------------------------------------------------------------------------
def im2col(x_nhwc, k=5, stride=2, pad=2):
    N, H, W, C = x_nhwc.shape
    Ho = (H + 2 * pad - k) // stride + 1
    Wo = (W + 2 * pad - k) // stride + 1
    xp = jnp.pad(x_nhwc, ((0, 0), (pad, pad), (pad, pad), (0, 0)))
    cols = []
    for di in range(k):
        for dj in range(k):
            cols.append(xp[:, di:di + stride * Ho:stride, dj:dj + stride * Wo:stride, :])
    patches = jnp.stack(cols, axis=3)                       # [N, Ho, Wo, k*k, C]
    return patches.reshape(N * Ho * Wo, k * k * C), Ho, Wo


def conv_layer(x_nhwc, w_oihw, b, *, gamma=None, beta=None, slope=0.2, eps=1e-5):
    """Conv2d(5x5, stride 2, pad 2) + bias, then either fused LeakyReLU
    (gamma is None) or fused-stats BatchNorm(train) + LeakyReLU."""
    Cout, Cin, kh, kw = w_oihw.shape
    N = x_nhwc.shape[0]
    patches, Ho, Wo = im2col(x_nhwc, k=kh, stride=2, pad=2)
    M = patches.shape[0]
    # PyTorch OIHW -> [kh, kw, Cin, Cout] -> [K, Cout] to match patch column order.
    wmat = jnp.transpose(w_oihw, (2, 3, 1, 0)).reshape(kh * kw * Cin, Cout)
    if gamma is None:
        y_p = matmul_fused(patches, wmat, b, leaky_slope=slope)
    else:
        y_p, s, ss = matmul_fused(patches, wmat, b, collect_stats=True)
        y_p = bn_lrelu_apply(y_p, s, ss, gamma, beta, m_true=M, eps=eps, slope=slope)
    return y_p[:M, :Cout].reshape(N, Ho, Wo, Cout)


def discriminator_forward(params, x_nchw):
    """Returns (output, x) exactly like the PyTorch module's forward."""
    x = jnp.transpose(x_nchw, (0, 2, 3, 1)).astype(jnp.float32)   # NCHW -> NHWC

    # layer 1: Conv -> LeakyReLU (fused epilogue)
    x = conv_layer(x, params["w1"], params["b1"])

    # layers 2..4: Conv (+ fused BN stats) -> BN(train)+LeakyReLU apply
    for i in (2, 3, 4):
        x = conv_layer(x, params[f"w{i}"], params[f"b{i}"],
                       gamma=params[f"g{i}"], beta=params[f"beta{i}"])

    # Flatten in NCHW order (matches torch.nn.Flatten for any spatial size).
    n = x.shape[0]
    feat = jnp.transpose(x, (0, 3, 1, 2)).reshape(n, -1)
    out_p = matmul_fused(feat, params["wl"], params["bl"])   # N padded to 128
    return out_p[:n, :1], x_nchw


def init_params(key, df_dim, ch, rows, cols):
    keys = jax.random.split(key, 12)
    params = {}
    dims = [(df_dim, ch), (df_dim * 2, df_dim), (df_dim * 4, df_dim * 2),
            (df_dim * 8, df_dim * 4)]
    for i, (co, ci) in enumerate(dims, start=1):
        params[f"w{i}"] = jax.random.normal(keys[2 * i - 2], (co, ci, 5, 5), jnp.float32) * 0.05
        params[f"b{i}"] = jax.random.normal(keys[2 * i - 1], (co,), jnp.float32) * 0.01
        if i >= 2:
            params[f"g{i}"] = jnp.ones((co,), jnp.float32)       # BN affine defaults
            params[f"beta{i}"] = jnp.zeros((co,), jnp.float32)
    in_feat = (rows // 16) * (cols // 16) * df_dim * 8
    params["wl"] = jax.random.normal(keys[8], (in_feat, 1), jnp.float32) * 0.05
    params["bl"] = jnp.zeros((1,), jnp.float32)
    return params


# ----------------------------------------------------------------------------
# References for correctness checks
# ----------------------------------------------------------------------------
def reference_forward_bf16(params, x_nchw):
    """Plain-JAX pipeline with the same numerics as the kernels (bf16 MXU
    inputs, f32 accumulation, E[x^2]-E[x]^2 batch stats)."""
    def conv(x_nhwc, w, b):
        Cout, Cin, kh, kw = w.shape
        patches, Ho, Wo = im2col(x_nhwc, k=kh, stride=2, pad=2)
        wmat = jnp.transpose(w, (2, 3, 1, 0)).reshape(kh * kw * Cin, Cout)
        y = jnp.dot(patches.astype(jnp.bfloat16), wmat.astype(jnp.bfloat16),
                    preferred_element_type=jnp.float32) + b[None, :]
        return y, (x_nhwc.shape[0], Ho, Wo, Cout)

    lrelu = lambda v: jnp.where(v > 0, v, 0.2 * v)
    x = jnp.transpose(x_nchw, (0, 2, 3, 1)).astype(jnp.float32)
    y, shp = conv(x, params["w1"], params["b1"])
    x = lrelu(y).reshape(shp)
    for i in (2, 3, 4):
        y, shp = conv(x, params[f"w{i}"], params[f"b{i}"])
        mean = jnp.mean(y, axis=0, keepdims=True)
        var = jnp.maximum(jnp.mean(y * y, axis=0, keepdims=True) - mean * mean, 0.0)
        y = ((y - mean) * jax.lax.rsqrt(var + 1e-5)
             * params[f"g{i}"][None, :] + params[f"beta{i}"][None, :])
        x = lrelu(y).reshape(shp)
    n = x.shape[0]
    feat = jnp.transpose(x, (0, 3, 1, 2)).reshape(n, -1)
    return jnp.dot(feat.astype(jnp.bfloat16), params["wl"].astype(jnp.bfloat16),
                   preferred_element_type=jnp.float32) + params["bl"][None, :]


def reference_forward_f32(params, x_nchw):
    """f32 PyTorch-semantics reference (train-mode BN with biased batch stats)."""
    def conv(x, w, b):
        y = jax.lax.conv_general_dilated(
            x, w, (2, 2), ((2, 2), (2, 2)),
            dimension_numbers=("NCHW", "OIHW", "NCHW"))
        return y + b[None, :, None, None]

    def bn(x, g, be, eps=1e-5):
        mean = jnp.mean(x, axis=(0, 2, 3), keepdims=True)
        var = jnp.mean((x - mean) ** 2, axis=(0, 2, 3), keepdims=True)
        return ((x - mean) * jax.lax.rsqrt(var + eps)
                * g[None, :, None, None] + be[None, :, None, None])

    lrelu = lambda v: jnp.where(v > 0, v, 0.2 * v)
    x = x_nchw
    x = lrelu(conv(x, params["w1"], params["b1"]))
    for i in (2, 3, 4):
        x = lrelu(bn(conv(x, params[f"w{i}"], params[f"b{i}"]),
                     params[f"g{i}"], params[f"beta{i}"]))
    feat = x.reshape(x.shape[0], -1)
    return feat @ params["wl"] + params["bl"][None, :]


if __name__ == "__main__":
    df_dim, ch, rows, cols, batch = 8, 4, 16, 16, 2
    key = jax.random.PRNGKey(0)
    pkey, xkey = jax.random.split(key)
    params = init_params(pkey, df_dim, ch, rows, cols)
    x = jax.random.normal(xkey, (batch, ch, rows, cols), jnp.float32)

    fwd = jax.jit(discriminator_forward)
    out, x_ret = fwd(params, x)
    out = jax.block_until_ready(out)

    assert out.shape == (batch, 1), out.shape
    assert jnp.array_equal(x_ret, x)

    # Tight check: same numerics as the kernel pipeline (validates tiling,
    # padding, masking, fused BN stats).
    ref_bf16 = reference_forward_bf16(params, x)
    assert jnp.allclose(out, ref_bf16, atol=5e-3, rtol=5e-3), (out, ref_bf16)

    # Looser semantic check vs the full-f32 PyTorch-style reference; bf16 MXU
    # inputs introduce ~1e-2-level deviations (expected, not a bug).
    ref_f32 = reference_forward_f32(params, x)
    assert jnp.allclose(out, ref_f32, atol=1e-1, rtol=1e-1), (out, ref_f32)

    print("KERNEL_OK")
</pallas_src>

<mosaic_0001>
module attributes {stable_mosaic.version = 11 : i64} {
  func.func @_conv_matmul_kernel(%arg0: i32, %arg1: i32, %arg2: i32, %arg3: memref<128x128xbf16, #tpu.memory_space<vmem>>, %arg4: memref<128x128xbf16, #tpu.memory_space<vmem>>, %arg5: memref<1x128xf32, #tpu.memory_space<vmem>>, %arg6: memref<128x128xf32, #tpu.memory_space<vmem>>, %arg7: memref<128x128xf32, #tpu.memory_space<vmem>>) attributes {dimension_semantics = [#tpu.dimension_semantics<parallel>, #tpu.dimension_semantics<parallel>, #tpu.dimension_semantics<arbitrary>], iteration_bounds = array<i64: 1, 1, 1>, scalar_prefetch = 0 : i64, scratch_operands = 1 : i64, tpu.core_type = #tpu.core_type<tc>, window_params = [{transform_indices = @transform_0, window_bounds = array<i64: 128, 128>}, {transform_indices = @transform_1, window_bounds = array<i64: 128, 128>}, {transform_indices = @transform_2, window_bounds = array<i64: 1, 128>}, {transform_indices = @transform_3, window_bounds = array<i64: 128, 128>}]} {
    %c0_i32 = arith.constant 0 : i32
    %0 = arith.cmpi eq, %arg2, %c0_i32 : i32
    %c0_i32_0 = arith.constant 0 : i32
    %1 = arith.cmpi eq, %arg2, %c0_i32_0 : i32
    %2 = arith.extui %1 : i1 to i32
    %c0_i32_1 = arith.constant 0 : i32
    %3 = arith.cmpi ne, %2, %c0_i32_1 : i32
    scf.if %3 {
      %cst_10 = arith.constant 0.000000e+00 : f32
      %12 = vector.broadcast %cst_10 : f32 to vector<128x128xf32>
      %c0_11 = arith.constant 0 : index
      %c0_12 = arith.constant 0 : index
      %13 = vector.load %arg7[%c0_11, %c0_12] : memref<128x128xf32, #tpu.memory_space<vmem>>, vector<128x128xf32>
      tpu.vector_store %arg7[%c0_11, %c0_12], %12 {strides = array<i32>} : memref<128x128xf32, #tpu.memory_space<vmem>>, vector<128x128xf32>,
    } else {
    }
    %c0 = arith.constant 0 : index
    %c0_2 = arith.constant 0 : index
    %4 = vector.load %arg7[%c0, %c0_2] : memref<128x128xf32, #tpu.memory_space<vmem>>, vector<128x128xf32>
    %c0_3 = arith.constant 0 : index
    %c0_4 = arith.constant 0 : index
    %5 = vector.load %arg3[%c0_3, %c0_4] : memref<128x128xbf16, #tpu.memory_space<vmem>>, vector<128x128xbf16>
    %c0_5 = arith.constant 0 : index
    %c0_6 = arith.constant 0 : index
    %6 = vector.load %arg4[%c0_5, %c0_6] : memref<128x128xbf16, #tpu.memory_space<vmem>>, vector<128x128xbf16>
    %cst = arith.constant dense<0.000000e+00> : vector<128x128xf32>
    %7 = tpu.matmul %5, %6, %cst {dimension_numbers = #tpu.dot_dimension_numbers<[1], [0], [0], [1], [0, 0, 1, 1], [], []>} : vector<128x128xbf16>, vector<128x128xbf16>, vector<128x128xf32> -> vector<128x128xf32>
    %8 = arith.addf %4, %7 : vector<128x128xf32>
    %c0_7 = arith.constant 0 : index
    %c0_8 = arith.constant 0 : index
    %9 = vector.load %arg7[%c0_7, %c0_8] : memref<128x128xf32, #tpu.memory_space<vmem>>, vector<128x128xf32>
    tpu.vector_store %arg7[%c0_7, %c0_8], %8 {strides = array<i32>} : memref<128x128xf32, #tpu.memory_space<vmem>>, vector<128x128xf32>,
    %10 = arith.extui %0 : i1 to i32
    %c0_i32_9 = arith.constant 0 : i32
    %11 = arith.cmpi ne, %10, %c0_i32_9 : i32
    scf.if %11 {
      %c0_10 = arith.constant 0 : index
      %c0_11 = arith.constant 0 : index
      %12 = vector.load %arg7[%c0_10, %c0_11] : memref<128x128xf32, #tpu.memory_space<vmem>>, vector<128x128xf32>
      %c0_12 = arith.constant 0 : index
      %c0_13 = arith.constant 0 : index
      %13 = vector.load %arg5[%c0_12, %c0_13] : memref<1x128xf32, #tpu.memory_space<vmem>>, vector<1x128xf32>
      %14 = vector.broadcast %13 : vector<1x128xf32> to vector<128x128xf32>
      %15 = arith.addf %12, %14 : vector<128x128xf32>
      %cst_14 = arith.constant 0.000000e+00 : f32
      %16 = vector.broadcast %cst_14 : f32 to vector<128x128xf32>
      %17 = arith.cmpf ogt, %15, %16 : vector<128x128xf32>
      %cst_15 = arith.constant 2.000000e-01 : f32
      %18 = vector.broadcast %cst_15 : f32 to vector<128x128xf32>
      %19 = arith.mulf %18, %15 : vector<128x128xf32>
      %20 = arith.select %17, %15, %19 : vector<128x128xi1>, vector<128x128xf32>
      %c0_16 = arith.constant 0 : index
      %c0_17 = arith.constant 0 : index
      %21 = vector.load %arg6[%c0_16, %c0_17] : memref<128x128xf32, #tpu.memory_space<vmem>>, vector<128x128xf32>
      tpu.vector_store %arg6[%c0_16, %c0_17], %20 {strides = array<i32>} : memref<128x128xf32, #tpu.memory_space<vmem>>, vector<128x128xf32>,
    } else {
    }
    return
  }
  func.func @transform_0(%arg0: i32, %arg1: i32, %arg2: i32) -> (i32, i32) {
    %c0_i32 = arith.constant 0 : i32
    return %arg1, %arg2 : i32, i32
  }
  func.func @transform_1(%arg0: i32, %arg1: i32, %arg2: i32) -> (i32, i32) {
    %c0_i32 = arith.constant 0 : i32
    return %arg2, %arg0 : i32, i32
  }
  func.func @transform_2(%arg0: i32, %arg1: i32, %arg2: i32) -> (i32, i32) {
    %c0_i32 = arith.constant 0 : i32
    %c0_i32_0 = arith.constant 0 : i32
    return %c0_i32, %arg0 : i32, i32
  }
  func.func @transform_3(%arg0: i32, %arg1: i32, %arg2: i32) -> (i32, i32) {
    %c0_i32 = arith.constant 0 : i32
    return %arg1, %arg0 : i32, i32
  }
}

module attributes {stable_mosaic.version = 11 : i64} {
  func.func @_conv_matmul_kernel(%arg0: i32, %arg1: i32, %arg2: i32, %arg3: memref<32x256xbf16, #tpu.memory_space<vmem>>, %arg4: memref<256x128xbf16, #tpu.memory_space<vmem>>, %arg5: memref<1x128xf32, #tpu.memory_space<vmem>>, %arg6: memref<32x128xf32, #tpu.memory_space<vmem>>, %arg7: memref<1x128xf32, #tpu.memory_space<vmem>>, %arg8: memref<1x128xf32, #tpu.memory_space<vmem>>, %arg9: memref<32x128xf32, #tpu.memory_space<vmem>>) attributes {dimension_semantics = [#tpu.dimension_semantics<parallel>, #tpu.dimension_semantics<arbitrary>, #tpu.dimension_semantics<arbitrary>], iteration_bounds = array<i64: 1, 1, 1>, scalar_prefetch = 0 : i64, scratch_operands = 1 : i64, tpu.core_type = #tpu.core_type<tc>, window_params = [{transform_indices = @transform_0, window_bounds = array<i64: 32, 256>}, {transform_indices = @transform_1, window_bounds = array<i64: 256, 128>}, {transform_indices = @transform_2, window_bounds = array<i64: 1, 128>}, {transform_indices = @transform_3, window_bounds = array<i64: 32, 128>}, {transform_indices = @transform_4, window_bounds = array<i64: 1, 128>}, {transform_indices = @transform_5, window_bounds = array<i64: 1, 128>}]} {
    %c0_i32 = arith.constant 0 : i32
    %0 = arith.cmpi eq, %arg2, %c0_i32 : i32
    %c0_i32_0 = arith.constant 0 : i32
    %1 = arith.cmpi eq, %arg2, %c0_i32_0 : i32
    %2 = arith.extui %1 : i1 to i32
    %c0_i32_1 = arith.constant 0 : i32
    %3 = arith.cmpi ne, %2, %c0_i32_1 : i32
    scf.if %3 {
      %cst_12 = arith.constant 0.000000e+00 : f32
      %16 = vector.broadcast %cst_12 : f32 to vector<32x128xf32>
      %c0_13 = arith.constant 0 : index
      %c0_14 = arith.constant 0 : index
      %17 = vector.load %arg9[%c0_13, %c0_14] : memref<32x128xf32, #tpu.memory_space<vmem>>, vector<32x128xf32>
      tpu.vector_store %arg9[%c0_13, %c0_14], %16 {strides = array<i32>} : memref<32x128xf32, #tpu.memory_space<vmem>>, vector<32x128xf32>,
    } else {
    }
    %c0 = arith.constant 0 : index
    %c0_2 = arith.constant 0 : index
    %4 = vector.load %arg9[%c0, %c0_2] : memref<32x128xf32, #tpu.memory_space<vmem>>, vector<32x128xf32>
    %c0_3 = arith.constant 0 : index
    %c0_4 = arith.constant 0 : index
    %5 = vector.load %arg3[%c0_3, %c0_4] : memref<32x256xbf16, #tpu.memory_space<vmem>>, vector<32x256xbf16>
    %c0_5 = arith.constant 0 : index
    %c0_6 = arith.constant 0 : index
    %6 = vector.load %arg4[%c0_5, %c0_6] : memref<256x128xbf16, #tpu.memory_space<vmem>>, vector<256x128xbf16>
    %cst = arith.constant dense<0.000000e+00> : vector<32x128xf32>
    %7 = tpu.matmul %5, %6, %cst {dimension_numbers = #tpu.dot_dimension_numbers<[1], [0], [0], [1], [0, 0, 1, 1], [], []>} : vector<32x256xbf16>, vector<256x128xbf16>, vector<32x128xf32> -> vector<32x128xf32>
    %8 = arith.addf %4, %7 : vector<32x128xf32>
    %c0_7 = arith.constant 0 : index
    %c0_8 = arith.constant 0 : index
    %9 = vector.load %arg9[%c0_7, %c0_8] : memref<32x128xf32, #tpu.memory_space<vmem>>, vector<32x128xf32>
    tpu.vector_store %arg9[%c0_7, %c0_8], %8 {strides = array<i32>} : memref<32x128xf32, #tpu.memory_space<vmem>>, vector<32x128xf32>,
    %c0_i32_9 = arith.constant 0 : i32
    %10 = arith.cmpi eq, %arg1, %c0_i32_9 : i32
    %11 = arith.andi %0, %10 : i1
    %12 = arith.extui %11 : i1 to i32
    %c0_i32_10 = arith.constant 0 : i32
    %13 = arith.cmpi ne, %12, %c0_i32_10 : i32
    scf.if %13 {
      %cst_12 = arith.constant 0.000000e+00 : f32
      %16 = vector.broadcast %cst_12 : f32 to vector<1x128xf32>
      %c0_13 = arith.constant 0 : index
      %c0_14 = arith.constant 0 : index
      %17 = vector.load %arg7[%c0_13, %c0_14] : memref<1x128xf32, #tpu.memory_space<vmem>>, vector<1x128xf32>
      tpu.vector_store %arg7[%c0_13, %c0_14], %16 {strides = array<i32>} : memref<1x128xf32, #tpu.memory_space<vmem>>, vector<1x128xf32>,
      %cst_15 = arith.constant 0.000000e+00 : f32
      %18 = vector.broadcast %cst_15 : f32 to vector<1x128xf32>
      %c0_16 = arith.constant 0 : index
      %c0_17 = arith.constant 0 : index
      %19 = vector.load %arg8[%c0_16, %c0_17] : memref<1x128xf32, #tpu.memory_space<vmem>>, vector<1x128xf32>
      tpu.vector_store %arg8[%c0_16, %c0_17], %18 {strides = array<i32>} : memref<1x128xf32, #tpu.memory_space<vmem>>, vector<1x128xf32>,
    } else {
    }
    %14 = arith.extui %0 : i1 to i32
    %c0_i32_11 = arith.constant 0 : i32
    %15 = arith.cmpi ne, %14, %c0_i32_11 : i32
    scf.if %15 {
      %c0_12 = arith.constant 0 : index
      %c0_13 = arith.constant 0 : index
      %16 = vector.load %arg9[%c0_12, %c0_13] : memref<32x128xf32, #tpu.memory_space<vmem>>, vector<32x128xf32>
      %c0_14 = arith.constant 0 : index
      %c0_15 = arith.constant 0 : index
      %17 = vector.load %arg5[%c0_14, %c0_15] : memref<1x128xf32, #tpu.memory_space<vmem>>, vector<1x128xf32>
      %18 = vector.broadcast %17 : vector<1x128xf32> to vector<32x128xf32>
      %19 = arith.addf %16, %18 : vector<32x128xf32>
      %c0_16 = arith.constant 0 : index
      %c0_17 = arith.constant 0 : index
      %20 = vector.load %arg6[%c0_16, %c0_17] : memref<32x128xf32, #tpu.memory_space<vmem>>, vector<32x128xf32>
      tpu.vector_store %arg6[%c0_16, %c0_17], %19 {strides = array<i32>} : memref<32x128xf32, #tpu.memory_space<vmem>>, vector<32x128xf32>,
      %c0_18 = arith.constant 0 : index
      %c0_19 = arith.constant 0 : index
      %21 = vector.load %arg7[%c0_18, %c0_19] : memref<1x128xf32, #tpu.memory_space<vmem>>, vector<1x128xf32>
      %cst_20 = arith.constant dense<0.000000e+00> : vector<128xf32>
      %22 = vector.multi_reduction <add>, %19, %cst_20 [0] : vector<32x128xf32> to vector<128xf32>
      %23 = vector.shape_cast %22 : vector<128xf32> to vector<1x128xf32>
      %24 = arith.addf %21, %23 : vector<1x128xf32>
      %c0_21 = arith.constant 0 : index
      %c0_22 = arith.constant 0 : index
      %25 = vector.load %arg7[%c0_21, %c0_22] : memref<1x128xf32, #tpu.memory_space<vmem>>, vector<1x128xf32>
      tpu.vector_store %arg7[%c0_21, %c0_22], %24 {strides = array<i32>} : memref<1x128xf32, #tpu.memory_space<vmem>>, vector<1x128xf32>,
      %c0_23 = arith.constant 0 : index
      %c0_24 = arith.constant 0 : index
      %26 = vector.load %arg8[%c0_23, %c0_24] : memref<1x128xf32, #tpu.memory_space<vmem>>, vector<1x128xf32>
      %27 = arith.mulf %19, %19 : vector<32x128xf32>
      %cst_25 = arith.constant dense<0.000000e+00> : vector<128xf32>
      %28 = vector.multi_reduction <add>, %27, %cst_25 [0] : vector<32x128xf32> to vector<128xf32>
      %29 = vector.shape_cast %28 : vector<128xf32> to vector<1x128xf32>
      %30 = arith.addf %26, %29 : vector<1x128xf32>
      %c0_26 = arith.constant 0 : index
      %c0_27 = arith.constant 0 : index
      %31 = vector.load %arg8[%c0_26, %c0_27] : memref<1x128xf32, #tpu.memory_space<vmem>>, vector<1x128xf32>
      tpu.vector_store %arg8[%c0_26, %c0_27], %30 {strides = array<i32>} : memref<1x128xf32, #tpu.memory_space<vmem>>, vector<1x128xf32>,
    } else {
    }
    return
  }
  func.func @transform_0(%arg0: i32, %arg1: i32, %arg2: i32) -> (i32, i32) {
    %c0_i32 = arith.constant 0 : i32
    return %arg1, %arg2 : i32, i32
  }
  func.func @transform_1(%arg0: i32, %arg1: i32, %arg2: i32) -> (i32, i32) {
    %c0_i32 = arith.constant 0 : i32
    return %arg2, %arg0 : i32, i32
  }
  func.func @transform_2(%arg0: i32, %arg1: i32, %arg2: i32) -> (i32, i32) {
    %c0_i32 = arith.constant 0 : i32
    %c0_i32_0 = arith.constant 0 : i32
    return %c0_i32, %arg0 : i32, i32
  }
  func.func @transform_3(%arg0: i32, %arg1: i32, %arg2: i32) -> (i32, i32) {
    %c0_i32 = arith.constant 0 : i32
    return %arg1, %arg0 : i32, i32
  }
  func.func @transform_4(%arg0: i32, %arg1: i32, %arg2: i32) -> (i32, i32) {
    %c0_i32 = arith.constant 0 : i32
    %c0_i32_0 = arith.constant 0 : i32
    return %c0_i32, %arg0 : i32, i32
  }
  func.func @transform_5(%arg0: i32, %arg1: i32, %arg2: i32) -> (i32, i32) {
    %c0_i32 = arith.constant 0 : i32
    %c0_i32_0 = arith.constant 0 : i32
    return %c0_i32, %arg0 : i32, i32
  }
}

module attributes {stable_mosaic.version = 11 : i64} {
  func.func @_bn_apply_kernel(%arg0: i32, %arg1: i32, %arg2: memref<32x128xf32, #tpu.memory_space<vmem>>, %arg3: memref<1x128xf32, #tpu.memory_space<vmem>>, %arg4: memref<1x128xf32, #tpu.memory_space<vmem>>, %arg5: memref<1x128xf32, #tpu.memory_space<vmem>>, %arg6: memref<1x128xf32, #tpu.memory_space<vmem>>, %arg7: memref<32x128xf32, #tpu.memory_space<vmem>>) attributes {dimension_semantics = [#tpu.dimension_semantics<parallel>, #tpu.dimension_semantics<parallel>], iteration_bounds = array<i64: 1, 1>, scalar_prefetch = 0 : i64, scratch_operands = 0 : i64, tpu.core_type = #tpu.core_type<tc>, window_params = [{transform_indices = @transform_0, window_bounds = array<i64: 32, 128>}, {transform_indices = @transform_1, window_bounds = array<i64: 1, 128>}, {transform_indices = @transform_2, window_bounds = array<i64: 1, 128>}, {transform_indices = @transform_3, window_bounds = array<i64: 1, 128>}, {transform_indices = @transform_4, window_bounds = array<i64: 1, 128>}, {transform_indices = @transform_5, window_bounds = array<i64: 32, 128>}]} {
    %c0 = arith.constant 0 : index
    %c0_0 = arith.constant 0 : index
    %0 = vector.load %arg3[%c0, %c0_0] : memref<1x128xf32, #tpu.memory_space<vmem>>, vector<1x128xf32>
    %cst = arith.constant 3.125000e-02 : f32
    %1 = vector.broadcast %cst : f32 to vector<1x128xf32>
    %2 = arith.mulf %0, %1 : vector<1x128xf32>
    %c0_1 = arith.constant 0 : index
    %c0_2 = arith.constant 0 : index
    %3 = vector.load %arg4[%c0_1, %c0_2] : memref<1x128xf32, #tpu.memory_space<vmem>>, vector<1x128xf32>
    %cst_3 = arith.constant 3.125000e-02 : f32
    %4 = vector.broadcast %cst_3 : f32 to vector<1x128xf32>
    %5 = arith.mulf %3, %4 : vector<1x128xf32>
    %6 = arith.mulf %2, %2 : vector<1x128xf32>
    %7 = arith.subf %5, %6 : vector<1x128xf32>
    %cst_4 = arith.constant 0.000000e+00 : f32
    %8 = vector.broadcast %cst_4 : f32 to vector<1x128xf32>
    %9 = arith.maximumf %7, %8 : vector<1x128xf32>
    %cst_5 = arith.constant 9.99999974E-6 : f32
    %10 = vector.broadcast %cst_5 : f32 to vector<1x128xf32>
    %11 = arith.addf %9, %10 : vector<1x128xf32>
    %12 = math.rsqrt %11 : vector<1x128xf32>
    %c0_6 = arith.constant 0 : index
    %c0_7 = arith.constant 0 : index
    %13 = vector.load %arg5[%c0_6, %c0_7] : memref<1x128xf32, #tpu.memory_space<vmem>>, vector<1x128xf32>
    %14 = arith.mulf %12, %13 : vector<1x128xf32>
    %c0_8 = arith.constant 0 : index
    %c0_9 = arith.constant 0 : index
    %15 = vector.load %arg2[%c0_8, %c0_9] : memref<32x128xf32, #tpu.memory_space<vmem>>, vector<32x128xf32>
    %16 = vector.broadcast %2 : vector<1x128xf32> to vector<32x128xf32>
    %17 = arith.subf %15, %16 : vector<32x128xf32>
    %18 = vector.broadcast %14 : vector<1x128xf32> to vector<32x128xf32>
    %19 = arith.mulf %17, %18 : vector<32x128xf32>
    %c0_10 = arith.constant 0 : index
    %c0_11 = arith.constant 0 : index
    %20 = vector.load %arg6[%c0_10, %c0_11] : memref<1x128xf32, #tpu.memory_space<vmem>>, vector<1x128xf32>
    %21 = vector.broadcast %20 : vector<1x128xf32> to vector<32x128xf32>
    %22 = arith.addf %19, %21 : vector<32x128xf32>
    %cst_12 = arith.constant 0.000000e+00 : f32
    %23 = vector.broadcast %cst_12 : f32 to vector<32x128xf32>
    %24 = arith.cmpf ogt, %22, %23 : vector<32x128xf32>
    %cst_13 = arith.constant 2.000000e-01 : f32
    %25 = vector.broadcast %cst_13 : f32 to vector<32x128xf32>
    %26 = arith.mulf %25, %22 : vector<32x128xf32>
    %27 = arith.select %24, %22, %26 : vector<32x128xi1>, vector<32x128xf32>
    %c0_14 = arith.constant 0 : index
    %c0_15 = arith.constant 0 : index
    %28 = vector.load %arg7[%c0_14, %c0_15] : memref<32x128xf32, #tpu.memory_space<vmem>>, vector<32x128xf32>
    tpu.vector_store %arg7[%c0_14, %c0_15], %27 {strides = array<i32>} : memref<32x128xf32, #tpu.memory_space<vmem>>, vector<32x128xf32>,
    return
  }
  func.func @transform_0(%arg0: i32, %arg1: i32) -> (i32, i32) {
    %c0_i32 = arith.constant 0 : i32
    return %arg0, %arg1 : i32, i32
  }
  func.func @transform_1(%arg0: i32, %arg1: i32) -> (i32, i32) {
    %c0_i32 = arith.constant 0 : i32
    %c0_i32_0 = arith.constant 0 : i32
    return %c0_i32, %arg1 : i32, i32
  }
  func.func @transform_2(%arg0: i32, %arg1: i32) -> (i32, i32) {
    %c0_i32 = arith.constant 0 : i32
    %c0_i32_0 = arith.constant 0 : i32
    return %c0_i32, %arg1 : i32, i32
  }
  func.func @transform_3(%arg0: i32, %arg1: i32) -> (i32, i32) {
    %c0_i32 = arith.constant 0 : i32
    %c0_i32_0 = arith.constant 0 : i32
    return %c0_i32, %arg1 : i32, i32
  }
  func.func @transform_4(%arg0: i32, %arg1: i32) -> (i32, i32) {
    %c0_i32 = arith.constant 0 : i32
    %c0_i32_0 = arith.constant 0 : i32
    return %c0_i32, %arg1 : i32, i32
  }
  func.func @transform_5(%arg0: i32, %arg1: i32) -> (i32, i32) {
    %c0_i32 = arith.constant 0 : i32
    return %arg0, %arg1 : i32, i32
  }
}

module attributes {stable_mosaic.version = 11 : i64} {
  func.func @_bn_apply_kernel(%arg0: i32, %arg1: i32, %arg2: memref<8x128xf32, #tpu.memory_space<vmem>>, %arg3: memref<1x128xf32, #tpu.memory_space<vmem>>, %arg4: memref<1x128xf32, #tpu.memory_space<vmem>>, %arg5: memref<1x128xf32, #tpu.memory_space<vmem>>, %arg6: memref<1x128xf32, #tpu.memory_space<vmem>>, %arg7: memref<8x128xf32, #tpu.memory_space<vmem>>) attributes {dimension_semantics = [#tpu.dimension_semantics<parallel>, #tpu.dimension_semantics<parallel>], iteration_bounds = array<i64: 1, 1>, scalar_prefetch = 0 : i64, scratch_operands = 0 : i64, tpu.core_type = #tpu.core_type<tc>, window_params = [{transform_indices = @transform_0, window_bounds = array<i64: 8, 128>}, {transform_indices = @transform_1, window_bounds = array<i64: 1, 128>}, {transform_indices = @transform_2, window_bounds = array<i64: 1, 128>}, {transform_indices = @transform_3, window_bounds = array<i64: 1, 128>}, {transform_indices = @transform_4, window_bounds = array<i64: 1, 128>}, {transform_indices = @transform_5, window_bounds = array<i64: 8, 128>}]} {
    %c0 = arith.constant 0 : index
    %c0_0 = arith.constant 0 : index
    %0 = vector.load %arg3[%c0, %c0_0] : memref<1x128xf32, #tpu.memory_space<vmem>>, vector<1x128xf32>
    %cst = arith.constant 1.250000e-01 : f32
    %1 = vector.broadcast %cst : f32 to vector<1x128xf32>
    %2 = arith.mulf %0, %1 : vector<1x128xf32>
    %c0_1 = arith.constant 0 : index
    %c0_2 = arith.constant 0 : index
    %3 = vector.load %arg4[%c0_1, %c0_2] : memref<1x128xf32, #tpu.memory_space<vmem>>, vector<1x128xf32>
    %cst_3 = arith.constant 1.250000e-01 : f32
    %4 = vector.broadcast %cst_3 : f32 to vector<1x128xf32>
    %5 = arith.mulf %3, %4 : vector<1x128xf32>
    %6 = arith.mulf %2, %2 : vector<1x128xf32>
    %7 = arith.subf %5, %6 : vector<1x128xf32>
    %cst_4 = arith.constant 0.000000e+00 : f32
    %8 = vector.broadcast %cst_4 : f32 to vector<1x128xf32>
    %9 = arith.maximumf %7, %8 : vector<1x128xf32>
    %cst_5 = arith.constant 9.99999974E-6 : f32
    %10 = vector.broadcast %cst_5 : f32 to vector<1x128xf32>
    %11 = arith.addf %9, %10 : vector<1x128xf32>
    %12 = math.rsqrt %11 : vector<1x128xf32>
    %c0_6 = arith.constant 0 : index
    %c0_7 = arith.constant 0 : index
    %13 = vector.load %arg5[%c0_6, %c0_7] : memref<1x128xf32, #tpu.memory_space<vmem>>, vector<1x128xf32>
    %14 = arith.mulf %12, %13 : vector<1x128xf32>
    %c0_8 = arith.constant 0 : index
    %c0_9 = arith.constant 0 : index
    %15 = vector.load %arg2[%c0_8, %c0_9] : memref<8x128xf32, #tpu.memory_space<vmem>>, vector<8x128xf32>
    %16 = vector.broadcast %2 : vector<1x128xf32> to vector<8x128xf32>
    %17 = arith.subf %15, %16 : vector<8x128xf32>
    %18 = vector.broadcast %14 : vector<1x128xf32> to vector<8x128xf32>
    %19 = arith.mulf %17, %18 : vector<8x128xf32>
    %c0_10 = arith.constant 0 : index
    %c0_11 = arith.constant 0 : index
    %20 = vector.load %arg6[%c0_10, %c0_11] : memref<1x128xf32, #tpu.memory_space<vmem>>, vector<1x128xf32>
    %21 = vector.broadcast %20 : vector<1x128xf32> to vector<8x128xf32>
    %22 = arith.addf %19, %21 : vector<8x128xf32>
    %cst_12 = arith.constant 0.000000e+00 : f32
    %23 = vector.broadcast %cst_12 : f32 to vector<8x128xf32>
    %24 = arith.cmpf ogt, %22, %23 : vector<8x128xf32>
    %cst_13 = arith.constant 2.000000e-01 : f32
    %25 = vector.broadcast %cst_13 : f32 to vector<8x128xf32>
    %26 = arith.mulf %25, %22 : vector<8x128xf32>
    %27 = arith.select %24, %22, %26 : vector<8x128xi1>, vector<8x128xf32>
    %c0_14 = arith.constant 0 : index
    %c0_15 = arith.constant 0 : index
    %28 = vector.load %arg7[%c0_14, %c0_15] : memref<8x128xf32, #tpu.memory_space<vmem>>, vector<8x128xf32>
    tpu.vector_store %arg7[%c0_14, %c0_15], %27 {strides = array<i32>} : memref<8x128xf32, #tpu.memory_space<vmem>>, vector<8x128xf32>,
    return
  }
  func.func @transform_0(%arg0: i32, %arg1: i32) -> (i32, i32) {
    %c0_i32 = arith.constant 0 : i32
    return %arg0, %arg1 : i32, i32
  }
  func.func @transform_1(%arg0: i32, %arg1: i32) -> (i32, i32) {
    %c0_i32 = arith.constant 0 : i32
    %c0_i32_0 = arith.constant 0 : i32
    return %c0_i32, %arg1 : i32, i32
  }
  func.func @transform_2(%arg0: i32, %arg1: i32) -> (i32, i32) {
    %c0_i32 = arith.constant 0 : i32
    %c0_i32_0 = arith.constant 0 : i32
    return %c0_i32, %arg1 : i32, i32
  }
  func.func @transform_3(%arg0: i32, %arg1: i32) -> (i32, i32) {
    %c0_i32 = arith.constant 0 : i32
    %c0_i32_0 = arith.constant 0 : i32
    return %c0_i32, %arg1 : i32, i32
  }
  func.func @transform_4(%arg0: i32, %arg1: i32) -> (i32, i32) {
    %c0_i32 = arith.constant 0 : i32
    %c0_i32_0 = arith.constant 0 : i32
    return %c0_i32, %arg1 : i32, i32
  }
  func.func @transform_5(%arg0: i32, %arg1: i32) -> (i32, i32) {
    %c0_i32 = arith.constant 0 : i32
    return %arg0, %arg1 : i32, i32
  }
}

module attributes {stable_mosaic.version = 11 : i64} {
  func.func @_conv_matmul_kernel(%arg0: i32, %arg1: i32, %arg2: i32, %arg3: memref<8x512xbf16, #tpu.memory_space<vmem>>, %arg4: memref<512x128xbf16, #tpu.memory_space<vmem>>, %arg5: memref<1x128xf32, #tpu.memory_space<vmem>>, %arg6: memref<8x128xf32, #tpu.memory_space<vmem>>, %arg7: memref<1x128xf32, #tpu.memory_space<vmem>>, %arg8: memref<1x128xf32, #tpu.memory_space<vmem>>, %arg9: memref<8x128xf32, #tpu.memory_space<vmem>>) attributes {dimension_semantics = [#tpu.dimension_semantics<parallel>, #tpu.dimension_semantics<arbitrary>, #tpu.dimension_semantics<arbitrary>], iteration_bounds = array<i64: 1, 1, 1>, scalar_prefetch = 0 : i64, scratch_operands = 1 : i64, tpu.core_type = #tpu.core_type<tc>, window_params = [{transform_indices = @transform_0, window_bounds = array<i64: 8, 512>}, {transform_indices = @transform_1, window_bounds = array<i64: 512, 128>}, {transform_indices = @transform_2, window_bounds = array<i64: 1, 128>}, {transform_indices = @transform_3, window_bounds = array<i64: 8, 128>}, {transform_indices = @transform_4, window_bounds = array<i64: 1, 128>}, {transform_indices = @transform_5, window_bounds = array<i64: 1, 128>}]} {
    %c0_i32 = arith.constant 0 : i32
    %0 = arith.cmpi eq, %arg2, %c0_i32 : i32
    %c0_i32_0 = arith.constant 0 : i32
    %1 = arith.cmpi eq, %arg2, %c0_i32_0 : i32
    %2 = arith.extui %1 : i1 to i32
    %c0_i32_1 = arith.constant 0 : i32
    %3 = arith.cmpi ne, %2, %c0_i32_1 : i32
    scf.if %3 {
      %cst_12 = arith.constant 0.000000e+00 : f32
      %16 = vector.broadcast %cst_12 : f32 to vector<8x128xf32>
      %c0_13 = arith.constant 0 : index
      %c0_14 = arith.constant 0 : index
      %17 = vector.load %arg9[%c0_13, %c0_14] : memref<8x128xf32, #tpu.memory_space<vmem>>, vector<8x128xf32>
      tpu.vector_store %arg9[%c0_13, %c0_14], %16 {strides = array<i32>} : memref<8x128xf32, #tpu.memory_space<vmem>>, vector<8x128xf32>,
    } else {
    }
    %c0 = arith.constant 0 : index
    %c0_2 = arith.constant 0 : index
    %4 = vector.load %arg9[%c0, %c0_2] : memref<8x128xf32, #tpu.memory_space<vmem>>, vector<8x128xf32>
    %c0_3 = arith.constant 0 : index
    %c0_4 = arith.constant 0 : index
    %5 = vector.load %arg3[%c0_3, %c0_4] : memref<8x512xbf16, #tpu.memory_space<vmem>>, vector<8x512xbf16>
    %c0_5 = arith.constant 0 : index
    %c0_6 = arith.constant 0 : index
    %6 = vector.load %arg4[%c0_5, %c0_6] : memref<512x128xbf16, #tpu.memory_space<vmem>>, vector<512x128xbf16>
    %cst = arith.constant dense<0.000000e+00> : vector<8x128xf32>
    %7 = tpu.matmul %5, %6, %cst {dimension_numbers = #tpu.dot_dimension_numbers<[1], [0], [0], [1], [0, 0, 1, 1], [], []>} : vector<8x512xbf16>, vector<512x128xbf16>, vector<8x128xf32> -> vector<8x128xf32>
    %8 = arith.addf %4, %7 : vector<8x128xf32>
    %c0_7 = arith.constant 0 : index
    %c0_8 = arith.constant 0 : index
    %9 = vector.load %arg9[%c0_7, %c0_8] : memref<8x128xf32, #tpu.memory_space<vmem>>, vector<8x128xf32>
    tpu.vector_store %arg9[%c0_7, %c0_8], %8 {strides = array<i32>} : memref<8x128xf32, #tpu.memory_space<vmem>>, vector<8x128xf32>,
    %c0_i32_9 = arith.constant 0 : i32
    %10 = arith.cmpi eq, %arg1, %c0_i32_9 : i32
    %11 = arith.andi %0, %10 : i1
    %12 = arith.extui %11 : i1 to i32
    %c0_i32_10 = arith.constant 0 : i32
    %13 = arith.cmpi ne, %12, %c0_i32_10 : i32
    scf.if %13 {
      %cst_12 = arith.constant 0.000000e+00 : f32
      %16 = vector.broadcast %cst_12 : f32 to vector<1x128xf32>
      %c0_13 = arith.constant 0 : index
      %c0_14 = arith.constant 0 : index
      %17 = vector.load %arg7[%c0_13, %c0_14] : memref<1x128xf32, #tpu.memory_space<vmem>>, vector<1x128xf32>
      tpu.vector_store %arg7[%c0_13, %c0_14], %16 {strides = array<i32>} : memref<1x128xf32, #tpu.memory_space<vmem>>, vector<1x128xf32>,
      %cst_15 = arith.constant 0.000000e+00 : f32
      %18 = vector.broadcast %cst_15 : f32 to vector<1x128xf32>
      %c0_16 = arith.constant 0 : index
      %c0_17 = arith.constant 0 : index
      %19 = vector.load %arg8[%c0_16, %c0_17] : memref<1x128xf32, #tpu.memory_space<vmem>>, vector<1x128xf32>
      tpu.vector_store %arg8[%c0_16, %c0_17], %18 {strides = array<i32>} : memref<1x128xf32, #tpu.memory_space<vmem>>, vector<1x128xf32>,
    } else {
    }
    %14 = arith.extui %0 : i1 to i32
    %c0_i32_11 = arith.constant 0 : i32
    %15 = arith.cmpi ne, %14, %c0_i32_11 : i32
    scf.if %15 {
      %c0_12 = arith.constant 0 : index
      %c0_13 = arith.constant 0 : index
      %16 = vector.load %arg9[%c0_12, %c0_13] : memref<8x128xf32, #tpu.memory_space<vmem>>, vector<8x128xf32>
      %c0_14 = arith.constant 0 : index
      %c0_15 = arith.constant 0 : index
      %17 = vector.load %arg5[%c0_14, %c0_15] : memref<1x128xf32, #tpu.memory_space<vmem>>, vector<1x128xf32>
      %18 = vector.broadcast %17 : vector<1x128xf32> to vector<8x128xf32>
      %19 = arith.addf %16, %18 : vector<8x128xf32>
      %c0_16 = arith.constant 0 : index
      %c0_17 = arith.constant 0 : index
      %20 = vector.load %arg6[%c0_16, %c0_17] : memref<8x128xf32, #tpu.memory_space<vmem>>, vector<8x128xf32>
      tpu.vector_store %arg6[%c0_16, %c0_17], %19 {strides = array<i32>} : memref<8x128xf32, #tpu.memory_space<vmem>>, vector<8x128xf32>,
      %c0_18 = arith.constant 0 : index
      %c0_19 = arith.constant 0 : index
      %21 = vector.load %arg7[%c0_18, %c0_19] : memref<1x128xf32, #tpu.memory_space<vmem>>, vector<1x128xf32>
      %cst_20 = arith.constant dense<0.000000e+00> : vector<128xf32>
      %22 = vector.multi_reduction <add>, %19, %cst_20 [0] : vector<8x128xf32> to vector<128xf32>
      %23 = vector.shape_cast %22 : vector<128xf32> to vector<1x128xf32>
      %24 = arith.addf %21, %23 : vector<1x128xf32>
      %c0_21 = arith.constant 0 : index
      %c0_22 = arith.constant 0 : index
      %25 = vector.load %arg7[%c0_21, %c0_22] : memref<1x128xf32, #tpu.memory_space<vmem>>, vector<1x128xf32>
      tpu.vector_store %arg7[%c0_21, %c0_22], %24 {strides = array<i32>} : memref<1x128xf32, #tpu.memory_space<vmem>>, vector<1x128xf32>,
      %c0_23 = arith.constant 0 : index
      %c0_24 = arith.constant 0 : index
      %26 = vector.load %arg8[%c0_23, %c0_24] : memref<1x128xf32, #tpu.memory_space<vmem>>, vector<1x128xf32>
      %27 = arith.mulf %19, %19 : vector<8x128xf32>
      %cst_25 = arith.constant dense<0.000000e+00> : vector<128xf32>
      %28 = vector.multi_reduction <add>, %27, %cst_25 [0] : vector<8x128xf32> to vector<128xf32>
      %29 = vector.shape_cast %28 : vector<128xf32> to vector<1x128xf32>
      %30 = arith.addf %26, %29 : vector<1x128xf32>
      %c0_26 = arith.constant 0 : index
      %c0_27 = arith.constant 0 : index
      %31 = vector.load %arg8[%c0_26, %c0_27] : memref<1x128xf32, #tpu.memory_space<vmem>>, vector<1x128xf32>
      tpu.vector_store %arg8[%c0_26, %c0_27], %30 {strides = array<i32>} : memref<1x128xf32, #tpu.memory_space<vmem>>, vector<1x128xf32>,
    } else {
    }
    return
  }
  func.func @transform_0(%arg0: i32, %arg1: i32, %arg2: i32) -> (i32, i32) {
    %c0_i32 = arith.constant 0 : i32
    return %arg1, %arg2 : i32, i32
  }
  func.func @transform_1(%arg0: i32, %arg1: i32, %arg2: i32) -> (i32, i32) {
    %c0_i32 = arith.constant 0 : i32
    return %arg2, %arg0 : i32, i32
  }
  func.func @transform_2(%arg0: i32, %arg1: i32, %arg2: i32) -> (i32, i32) {
    %c0_i32 = arith.constant 0 : i32
    %c0_i32_0 = arith.constant 0 : i32
    return %c0_i32, %arg0 : i32, i32
  }
  func.func @transform_3(%arg0: i32, %arg1: i32, %arg2: i32) -> (i32, i32) {
    %c0_i32 = arith.constant 0 : i32
    return %arg1, %arg0 : i32, i32
  }
  func.func @transform_4(%arg0: i32, %arg1: i32, %arg2: i32) -> (i32, i32) {
    %c0_i32 = arith.constant 0 : i32
    %c0_i32_0 = arith.constant 0 : i32
    return %c0_i32, %arg0 : i32, i32
  }
  func.func @transform_5(%arg0: i32, %arg1: i32, %arg2: i32) -> (i32, i32) {
    %c0_i32 = arith.constant 0 : i32
    %c0_i32_0 = arith.constant 0 : i32
    return %c0_i32, %arg0 : i32, i32
  }
}

module attributes {stable_mosaic.version = 11 : i64} {
  func.func @_conv_matmul_kernel(%arg0: i32, %arg1: i32, %arg2: i32, %arg3: memref<8x512xbf16, #tpu.memory_space<vmem>>, %arg4: memref<512x128xbf16, #tpu.memory_space<vmem>>, %arg5: memref<1x128xf32, #tpu.memory_space<vmem>>, %arg6: memref<8x128xf32, #tpu.memory_space<vmem>>, %arg7: memref<1x128xf32, #tpu.memory_space<vmem>>, %arg8: memref<1x128xf32, #tpu.memory_space<vmem>>, %arg9: memref<8x128xf32, #tpu.memory_space<vmem>>) attributes {dimension_semantics = [#tpu.dimension_semantics<parallel>, #tpu.dimension_semantics<arbitrary>, #tpu.dimension_semantics<arbitrary>], iteration_bounds = array<i64: 1, 1, 2>, scalar_prefetch = 0 : i64, scratch_operands = 1 : i64, tpu.core_type = #tpu.core_type<tc>, window_params = [{transform_indices = @transform_0, window_bounds = array<i64: 8, 512>}, {transform_indices = @transform_1, window_bounds = array<i64: 512, 128>}, {transform_indices = @transform_2, window_bounds = array<i64: 1, 128>}, {transform_indices = @transform_3, window_bounds = array<i64: 8, 128>}, {transform_indices = @transform_4, window_bounds = array<i64: 1, 128>}, {transform_indices = @transform_5, window_bounds = array<i64: 1, 128>}]} {
    %c1_i32 = arith.constant 1 : i32
    %0 = arith.cmpi eq, %arg2, %c1_i32 : i32
    %c0_i32 = arith.constant 0 : i32
    %1 = arith.cmpi eq, %arg2, %c0_i32 : i32
    %2 = arith.extui %1 : i1 to i32
    %c0_i32_0 = arith.constant 0 : i32
    %3 = arith.cmpi ne, %2, %c0_i32_0 : i32
    scf.if %3 {
      %cst_11 = arith.constant 0.000000e+00 : f32
      %16 = vector.broadcast %cst_11 : f32 to vector<8x128xf32>
      %c0_12 = arith.constant 0 : index
      %c0_13 = arith.constant 0 : index
      %17 = vector.load %arg9[%c0_12, %c0_13] : memref<8x128xf32, #tpu.memory_space<vmem>>, vector<8x128xf32>
      tpu.vector_store %arg9[%c0_12, %c0_13], %16 {strides = array<i32>} : memref<8x128xf32, #tpu.memory_space<vmem>>, vector<8x128xf32>,
    } else {
    }
    %c0 = arith.constant 0 : index
    %c0_1 = arith.constant 0 : index
    %4 = vector.load %arg9[%c0, %c0_1] : memref<8x128xf32, #tpu.memory_space<vmem>>, vector<8x128xf32>
    %c0_2 = arith.constant 0 : index
    %c0_3 = arith.constant 0 : index
    %5 = vector.load %arg3[%c0_2, %c0_3] : memref<8x512xbf16, #tpu.memory_space<vmem>>, vector<8x512xbf16>
    %c0_4 = arith.constant 0 : index
    %c0_5 = arith.constant 0 : index
    %6 = vector.load %arg4[%c0_4, %c0_5] : memref<512x128xbf16, #tpu.memory_space<vmem>>, vector<512x128xbf16>
    %cst = arith.constant dense<0.000000e+00> : vector<8x128xf32>
    %7 = tpu.matmul %5, %6, %cst {dimension_numbers = #tpu.dot_dimension_numbers<[1], [0], [0], [1], [0, 0, 1, 1], [], []>} : vector<8x512xbf16>, vector<512x128xbf16>, vector<8x128xf32> -> vector<8x128xf32>
    %8 = arith.addf %4, %7 : vector<8x128xf32>
    %c0_6 = arith.constant 0 : index
    %c0_7 = arith.constant 0 : index
    %9 = vector.load %arg9[%c0_6, %c0_7] : memref<8x128xf32, #tpu.memory_space<vmem>>, vector<8x128xf32>
    tpu.vector_store %arg9[%c0_6, %c0_7], %8 {strides = array<i32>} : memref<8x128xf32, #tpu.memory_space<vmem>>, vector<8x128xf32>,
    %c0_i32_8 = arith.constant 0 : i32
    %10 = arith.cmpi eq, %arg1, %c0_i32_8 : i32
    %11 = arith.andi %0, %10 : i1
    %12 = arith.extui %11 : i1 to i32
    %c0_i32_9 = arith.constant 0 : i32
    %13 = arith.cmpi ne, %12, %c0_i32_9 : i32
    scf.if %13 {
      %cst_11 = arith.constant 0.000000e+00 : f32
      %16 = vector.broadcast %cst_11 : f32 to vector<1x128xf32>
      %c0_12 = arith.constant 0 : index
      %c0_13 = arith.constant 0 : index
      %17 = vector.load %arg7[%c0_12, %c0_13] : memref<1x128xf32, #tpu.memory_space<vmem>>, vector<1x128xf32>
      tpu.vector_store %arg7[%c0_12, %c0_13], %16 {strides = array<i32>} : memref<1x128xf32, #tpu.memory_space<vmem>>, vector<1x128xf32>,
      %cst_14 = arith.constant 0.000000e+00 : f32
      %18 = vector.broadcast %cst_14 : f32 to vector<1x128xf32>
      %c0_15 = arith.constant 0 : index
      %c0_16 = arith.constant 0 : index
      %19 = vector.load %arg8[%c0_15, %c0_16] : memref<1x128xf32, #tpu.memory_space<vmem>>, vector<1x128xf32>
      tpu.vector_store %arg8[%c0_15, %c0_16], %18 {strides = array<i32>} : memref<1x128xf32, #tpu.memory_space<vmem>>, vector<1x128xf32>,
    } else {
    }
    %14 = arith.extui %0 : i1 to i32
    %c0_i32_10 = arith.constant 0 : i32
    %15 = arith.cmpi ne, %14, %c0_i32_10 : i32
    scf.if %15 {
      %c0_11 = arith.constant 0 : index
      %c0_12 = arith.constant 0 : index
      %16 = vector.load %arg9[%c0_11, %c0_12] : memref<8x128xf32, #tpu.memory_space<vmem>>, vector<8x128xf32>
      %c0_13 = arith.constant 0 : index
      %c0_14 = arith.constant 0 : index
      %17 = vector.load %arg5[%c0_13, %c0_14] : memref<1x128xf32, #tpu.memory_space<vmem>>, vector<1x128xf32>
      %18 = vector.broadcast %17 : vector<1x128xf32> to vector<8x128xf32>
      %19 = arith.addf %16, %18 : vector<8x128xf32>
      %c0_15 = arith.constant 0 : index
      %c0_16 = arith.constant 0 : index
      %20 = vector.load %arg6[%c0_15, %c0_16] : memref<8x128xf32, #tpu.memory_space<vmem>>, vector<8x128xf32>
      tpu.vector_store %arg6[%c0_15, %c0_16], %19 {strides = array<i32>} : memref<8x128xf32, #tpu.memory_space<vmem>>, vector<8x128xf32>,
      %21 = tpu.iota {dimensions = array<i32: 0>} : vector<8x1xi32>
      %c8_i32 = arith.constant 8 : i32
      %22 = arith.muli %arg1, %c8_i32 : i32
      %23 = vector.broadcast %22 : i32 to vector<8x1xi32>
      %24 = arith.addi %21, %23 : vector<8x1xi32>
      %c2_i32 = arith.constant 2 : i32
      %25 = vector.broadcast %c2_i32 : i32 to vector<8x1xi32>
      %26 = arith.cmpi slt, %24, %25 : vector<8x1xi32>
      %27 = arith.extui %26 : vector<8x1xi1> to vector<8x1xi32>
      %28 = arith.sitofp %27 : vector<8x1xi32> to vector<8x1xf32>
      %29 = vector.broadcast %28 : vector<8x1xf32> to vector<8x128xf32>
      %30 = arith.mulf %19, %29 : vector<8x128xf32>
      %c0_17 = arith.constant 0 : index
      %c0_18 = arith.constant 0 : index
      %31 = vector.load %arg7[%c0_17, %c0_18] : memref<1x128xf32, #tpu.memory_space<vmem>>, vector<1x128xf32>
      %cst_19 = arith.constant dense<0.000000e+00> : vector<128xf32>
      %32 = vector.multi_reduction <add>, %30, %cst_19 [0] : vector<8x128xf32> to vector<128xf32>
      %33 = vector.shape_cast %32 : vector<128xf32> to vector<1x128xf32>
      %34 = arith.addf %31, %33 : vector<1x128xf32>
      %c0_20 = arith.constant 0 : index
      %c0_21 = arith.constant 0 : index
      %35 = vector.load %arg7[%c0_20, %c0_21] : memref<1x128xf32, #tpu.memory_space<vmem>>, vector<1x128xf32>
      tpu.vector_store %arg7[%c0_20, %c0_21], %34 {strides = array<i32>} : memref<1x128xf32, #tpu.memory_space<vmem>>, vector<1x128xf32>,
      %c0_22 = arith.constant 0 : index
      %c0_23 = arith.constant 0 : index
      %36 = vector.load %arg8[%c0_22, %c0_23] : memref<1x128xf32, #tpu.memory_space<vmem>>, vector<1x128xf32>
      %37 = arith.mulf %30, %30 : vector<8x128xf32>
      %cst_24 = arith.constant dense<0.000000e+00> : vector<128xf32>
      %38 = vector.multi_reduction <add>, %37, %cst_24 [0] : vector<8x128xf32> to vector<128xf32>
      %39 = vector.shape_cast %38 : vector<128xf32> to vector<1x128xf32>
      %40 = arith.addf %36, %39 : vector<1x128xf32>
      %c0_25 = arith.constant 0 : index
      %c0_26 = arith.constant 0 : index
      %41 = vector.load %arg8[%c0_25, %c0_26] : memref<1x128xf32, #tpu.memory_space<vmem>>, vector<1x128xf32>
      tpu.vector_store %arg8[%c0_25, %c0_26], %40 {strides = array<i32>} : memref<1x128xf32, #tpu.memory_space<vmem>>, vector<1x128xf32>,
    } else {
    }
    return
  }
  func.func @transform_0(%arg0: i32, %arg1: i32, %arg2: i32) -> (i32, i32) {
    %c0_i32 = arith.constant 0 : i32
    return %arg1, %arg2 : i32, i32
  }
  func.func @transform_1(%arg0: i32, %arg1: i32, %arg2: i32) -> (i32, i32) {
    %c0_i32 = arith.constant 0 : i32
    return %arg2, %arg0 : i32, i32
  }
  func.func @transform_2(%arg0: i32, %arg1: i32, %arg2: i32) -> (i32, i32) {
    %c0_i32 = arith.constant 0 : i32
    %c0_i32_0 = arith.constant 0 : i32
    return %c0_i32, %arg0 : i32, i32
  }
  func.func @transform_3(%arg0: i32, %arg1: i32, %arg2: i32) -> (i32, i32) {
    %c0_i32 = arith.constant 0 : i32
    return %arg1, %arg0 : i32, i32
  }
  func.func @transform_4(%arg0: i32, %arg1: i32, %arg2: i32) -> (i32, i32) {
    %c0_i32 = arith.constant 0 : i32
    %c0_i32_0 = arith.constant 0 : i32
    return %c0_i32, %arg0 : i32, i32
  }
  func.func @transform_5(%arg0: i32, %arg1: i32, %arg2: i32) -> (i32, i32) {
    %c0_i32 = arith.constant 0 : i32
    %c0_i32_0 = arith.constant 0 : i32
    return %c0_i32, %arg0 : i32, i32
  }
}

module attributes {stable_mosaic.version = 11 : i64} {
  func.func @_bn_apply_kernel(%arg0: i32, %arg1: i32, %arg2: memref<8x128xf32, #tpu.memory_space<vmem>>, %arg3: memref<1x128xf32, #tpu.memory_space<vmem>>, %arg4: memref<1x128xf32, #tpu.memory_space<vmem>>, %arg5: memref<1x128xf32, #tpu.memory_space<vmem>>, %arg6: memref<1x128xf32, #tpu.memory_space<vmem>>, %arg7: memref<8x128xf32, #tpu.memory_space<vmem>>) attributes {dimension_semantics = [#tpu.dimension_semantics<parallel>, #tpu.dimension_semantics<parallel>], iteration_bounds = array<i64: 1, 1>, scalar_prefetch = 0 : i64, scratch_operands = 0 : i64, tpu.core_type = #tpu.core_type<tc>, window_params = [{transform_indices = @transform_0, window_bounds = array<i64: 8, 128>}, {transform_indices = @transform_1, window_bounds = array<i64: 1, 128>}, {transform_indices = @transform_2, window_bounds = array<i64: 1, 128>}, {transform_indices = @transform_3, window_bounds = array<i64: 1, 128>}, {transform_indices = @transform_4, window_bounds = array<i64: 1, 128>}, {transform_indices = @transform_5, window_bounds = array<i64: 8, 128>}]} {
    %c0 = arith.constant 0 : index
    %c0_0 = arith.constant 0 : index
    %0 = vector.load %arg3[%c0, %c0_0] : memref<1x128xf32, #tpu.memory_space<vmem>>, vector<1x128xf32>
    %cst = arith.constant 5.000000e-01 : f32
    %1 = vector.broadcast %cst : f32 to vector<1x128xf32>
    %2 = arith.mulf %0, %1 : vector<1x128xf32>
    %c0_1 = arith.constant 0 : index
    %c0_2 = arith.constant 0 : index
    %3 = vector.load %arg4[%c0_1, %c0_2] : memref<1x128xf32, #tpu.memory_space<vmem>>, vector<1x128xf32>
    %cst_3 = arith.constant 5.000000e-01 : f32
    %4 = vector.broadcast %cst_3 : f32 to vector<1x128xf32>
    %5 = arith.mulf %3, %4 : vector<1x128xf32>
    %6 = arith.mulf %2, %2 : vector<1x128xf32>
    %7 = arith.subf %5, %6 : vector<1x128xf32>
    %cst_4 = arith.constant 0.000000e+00 : f32
    %8 = vector.broadcast %cst_4 : f32 to vector<1x128xf32>
    %9 = arith.maximumf %7, %8 : vector<1x128xf32>
    %cst_5 = arith.constant 9.99999974E-6 : f32
    %10 = vector.broadcast %cst_5 : f32 to vector<1x128xf32>
    %11 = arith.addf %9, %10 : vector<1x128xf32>
    %12 = math.rsqrt %11 : vector<1x128xf32>
    %c0_6 = arith.constant 0 : index
    %c0_7 = arith.constant 0 : index
    %13 = vector.load %arg5[%c0_6, %c0_7] : memref<1x128xf32, #tpu.memory_space<vmem>>, vector<1x128xf32>
    %14 = arith.mulf %12, %13 : vector<1x128xf32>
    %c0_8 = arith.constant 0 : index
    %c0_9 = arith.constant 0 : index
    %15 = vector.load %arg2[%c0_8, %c0_9] : memref<8x128xf32, #tpu.memory_space<vmem>>, vector<8x128xf32>
    %16 = vector.broadcast %2 : vector<1x128xf32> to vector<8x128xf32>
    %17 = arith.subf %15, %16 : vector<8x128xf32>
    %18 = vector.broadcast %14 : vector<1x128xf32> to vector<8x128xf32>
    %19 = arith.mulf %17, %18 : vector<8x128xf32>
    %c0_10 = arith.constant 0 : index
    %c0_11 = arith.constant 0 : index
    %20 = vector.load %arg6[%c0_10, %c0_11] : memref<1x128xf32, #tpu.memory_space<vmem>>, vector<1x128xf32>
    %21 = vector.broadcast %20 : vector<1x128xf32> to vector<8x128xf32>
    %22 = arith.addf %19, %21 : vector<8x128xf32>
    %cst_12 = arith.constant 0.000000e+00 : f32
    %23 = vector.broadcast %cst_12 : f32 to vector<8x128xf32>
    %24 = arith.cmpf ogt, %22, %23 : vector<8x128xf32>
    %cst_13 = arith.constant 2.000000e-01 : f32
    %25 = vector.broadcast %cst_13 : f32 to vector<8x128xf32>
    %26 = arith.mulf %25, %22 : vector<8x128xf32>
    %27 = arith.select %24, %22, %26 : vector<8x128xi1>, vector<8x128xf32>
    %c0_14 = arith.constant 0 : index
    %c0_15 = arith.constant 0 : index
    %28 = vector.load %arg7[%c0_14, %c0_15] : memref<8x128xf32, #tpu.memory_space<vmem>>, vector<8x128xf32>
    tpu.vector_store %arg7[%c0_14, %c0_15], %27 {strides = array<i32>} : memref<8x128xf32, #tpu.memory_space<vmem>>, vector<8x128xf32>,
    return
  }
  func.func @transform_0(%arg0: i32, %arg1: i32) -> (i32, i32) {
    %c0_i32 = arith.constant 0 : i32
    return %arg0, %arg1 : i32, i32
  }
  func.func @transform_1(%arg0: i32, %arg1: i32) -> (i32, i32) {
    %c0_i32 = arith.constant 0 : i32
    %c0_i32_0 = arith.constant 0 : i32
    return %c0_i32, %arg1 : i32, i32
  }
  func.func @transform_2(%arg0: i32, %arg1: i32) -> (i32, i32) {
    %c0_i32 = arith.constant 0 : i32
    %c0_i32_0 = arith.constant 0 : i32
    return %c0_i32, %arg1 : i32, i32
  }
  func.func @transform_3(%arg0: i32, %arg1: i32) -> (i32, i32) {
    %c0_i32 = arith.constant 0 : i32
    %c0_i32_0 = arith.constant 0 : i32
    return %c0_i32, %arg1 : i32, i32
  }
  func.func @transform_4(%arg0: i32, %arg1: i32) -> (i32, i32) {
    %c0_i32 = arith.constant 0 : i32
    %c0_i32_0 = arith.constant 0 : i32
    return %c0_i32, %arg1 : i32, i32
  }
  func.func @transform_5(%arg0: i32, %arg1: i32) -> (i32, i32) {
    %c0_i32 = arith.constant 0 : i32
    return %arg0, %arg1 : i32, i32
  }
}

module attributes {stable_mosaic.version = 11 : i64} {
  func.func @_conv_matmul_kernel(%arg0: i32, %arg1: i32, %arg2: i32, %arg3: memref<8x128xbf16, #tpu.memory_space<vmem>>, %arg4: memref<128x128xbf16, #tpu.memory_space<vmem>>, %arg5: memref<1x128xf32, #tpu.memory_space<vmem>>, %arg6: memref<8x128xf32, #tpu.memory_space<vmem>>, %arg7: memref<8x128xf32, #tpu.memory_space<vmem>>) attributes {dimension_semantics = [#tpu.dimension_semantics<parallel>, #tpu.dimension_semantics<parallel>, #tpu.dimension_semantics<arbitrary>], iteration_bounds = array<i64: 1, 1, 1>, scalar_prefetch = 0 : i64, scratch_operands = 1 : i64, tpu.core_type = #tpu.core_type<tc>, window_params = [{transform_indices = @transform_0, window_bounds = array<i64: 8, 128>}, {transform_indices = @transform_1, window_bounds = array<i64: 128, 128>}, {transform_indices = @transform_2, window_bounds = array<i64: 1, 128>}, {transform_indices = @transform_3, window_bounds = array<i64: 8, 128>}]} {
    %c0_i32 = arith.constant 0 : i32
    %0 = arith.cmpi eq, %arg2, %c0_i32 : i32
    %c0_i32_0 = arith.constant 0 : i32
    %1 = arith.cmpi eq, %arg2, %c0_i32_0 : i32
    %2 = arith.extui %1 : i1 to i32
    %c0_i32_1 = arith.constant 0 : i32
    %3 = arith.cmpi ne, %2, %c0_i32_1 : i32
    scf.if %3 {
      %cst_10 = arith.constant 0.000000e+00 : f32
      %12 = vector.broadcast %cst_10 : f32 to vector<8x128xf32>
      %c0_11 = arith.constant 0 : index
      %c0_12 = arith.constant 0 : index
      %13 = vector.load %arg7[%c0_11, %c0_12] : memref<8x128xf32, #tpu.memory_space<vmem>>, vector<8x128xf32>
      tpu.vector_store %arg7[%c0_11, %c0_12], %12 {strides = array<i32>} : memref<8x128xf32, #tpu.memory_space<vmem>>, vector<8x128xf32>,
    } else {
    }
    %c0 = arith.constant 0 : index
    %c0_2 = arith.constant 0 : index
    %4 = vector.load %arg7[%c0, %c0_2] : memref<8x128xf32, #tpu.memory_space<vmem>>, vector<8x128xf32>
    %c0_3 = arith.constant 0 : index
    %c0_4 = arith.constant 0 : index
    %5 = vector.load %arg3[%c0_3, %c0_4] : memref<8x128xbf16, #tpu.memory_space<vmem>>, vector<8x128xbf16>
    %c0_5 = arith.constant 0 : index
    %c0_6 = arith.constant 0 : index
    %6 = vector.load %arg4[%c0_5, %c0_6] : memref<128x128xbf16, #tpu.memory_space<vmem>>, vector<128x128xbf16>
    %cst = arith.constant dense<0.000000e+00> : vector<8x128xf32>
    %7 = tpu.matmul %5, %6, %cst {dimension_numbers = #tpu.dot_dimension_numbers<[1], [0], [0], [1], [0, 0, 1, 1], [], []>} : vector<8x128xbf16>, vector<128x128xbf16>, vector<8x128xf32> -> vector<8x128xf32>
    %8 = arith.addf %4, %7 : vector<8x128xf32>
    %c0_7 = arith.constant 0 : index
    %c0_8 = arith.constant 0 : index
    %9 = vector.load %arg7[%c0_7, %c0_8] : memref<8x128xf32, #tpu.memory_space<vmem>>, vector<8x128xf32>
    tpu.vector_store %arg7[%c0_7, %c0_8], %8 {strides = array<i32>} : memref<8x128xf32, #tpu.memory_space<vmem>>, vector<8x128xf32>,
    %10 = arith.extui %0 : i1 to i32
    %c0_i32_9 = arith.constant 0 : i32
    %11 = arith.cmpi ne, %10, %c0_i32_9 : i32
    scf.if %11 {
      %c0_10 = arith.constant 0 : index
      %c0_11 = arith.constant 0 : index
      %12 = vector.load %arg7[%c0_10, %c0_11] : memref<8x128xf32, #tpu.memory_space<vmem>>, vector<8x128xf32>
      %c0_12 = arith.constant 0 : index
      %c0_13 = arith.constant 0 : index
      %13 = vector.load %arg5[%c0_12, %c0_13] : memref<1x128xf32, #tpu.memory_space<vmem>>, vector<1x128xf32>
      %14 = vector.broadcast %13 : vector<1x128xf32> to vector<8x128xf32>
      %15 = arith.addf %12, %14 : vector<8x128xf32>
      %c0_14 = arith.constant 0 : index
      %c0_15 = arith.constant 0 : index
      %16 = vector.load %arg6[%c0_14, %c0_15] : memref<8x128xf32, #tpu.memory_space<vmem>>, vector<8x128xf32>
      tpu.vector_store %arg6[%c0_14, %c0_15], %15 {strides = array<i32>} : memref<8x128xf32, #tpu.memory_space<vmem>>, vector<8x128xf32>,
    } else {
    }
    return
  }
  func.func @transform_0(%arg0: i32, %arg1: i32, %arg2: i32) -> (i32, i32) {
    %c0_i32 = arith.constant 0 : i32
    return %arg1, %arg2 : i32, i32
  }
  func.func @transform_1(%arg0: i32, %arg1: i32, %arg2: i32) -> (i32, i32) {
    %c0_i32 = arith.constant 0 : i32
    return %arg2, %arg0 : i32, i32
  }
  func.func @transform_2(%arg0: i32, %arg1: i32, %arg2: i32) -> (i32, i32) {
    %c0_i32 = arith.constant 0 : i32
    %c0_i32_0 = arith.constant 0 : i32
    return %c0_i32, %arg0 : i32, i32
  }
  func.func @transform_3(%arg0: i32, %arg1: i32, %arg2: i32) -> (i32, i32) {
    %c0_i32 = arith.constant 0 : i32
    return %arg1, %arg0 : i32, i32
  }
}

</mosaic_0001>

<bundles_post_ra>
// kernel: discriminator_forward.8
= control target key start
LH: loop header
LB: loop body
LE: loop exit
PB: predicated region body
PF: predicated region fallthrough
CT: control target
= control target key end

     0   :  { %s608_s1 = inlined_call_operand.vmem [shape: bf16[128,128], index: 1, kind: input, shape index: {}]   ;;  %s609_s2 = inlined_call_operand.vmem [shape: f32[1,128], index: 2, kind: input, shape index: {}]   ;;  %s610_s0 = inlined_call_operand.vmem [shape: bf16[128,128], index: 0, kind: input, shape index: {}]   ;;  %s611_s3 = inlined_call_operand.vmem [shape: f32[128,128], index: 3, kind: output, shape index: {}]  }
   0x1   :  { %v445_v0 = vld [vmem:[%s608_s1 + $0x38] sm:$0xff]  ;;  %v444_v1 = vld [vmem:[%s608_s1 + $0x30] sm:$0xff]  ;;  %v443_v2 = vld [vmem:[%s608_s1 + $0x28] sm:$0xff] }
   0x2   :  { %178 = vmatpush.bf16.msra.mxu0 %v445_v0  ;;  %446 = vmatpush.bf16.msra.mxu1 %v445_v0  ;;  %v442_v3 = vld [vmem:[%s608_s1 + $0x20] sm:$0xff]  ;;  %v441_v4 = vld [vmem:[%s608_s1 + $0x18] sm:$0xff]  ;;  %v440_v5 = vld [vmem:[%s608_s1 + $0x10] sm:$0xff] }
   0x3   :  { %447 = vmatpush.bf16.msra.mxu2 %v445_v0  ;;  %448 = vmatpush.bf16.msra.mxu3 %v445_v0  ;;  %v439_v6 = vld [vmem:[%s608_s1 + $0x8] sm:$0xff]  ;;  %v438_v7 = vld [vmem:[%s608_s1] sm:$0xff]  ;;  %v432_v9 = vld [vmem:[%s610_s0 + $0x10] sm:$0xff] }
   0x4   :  { %v430_v8 = vld [vmem:[%s610_s0] sm:$0xff]  ;;  %v436_v11 = vld [vmem:[%s610_s0 + $0x30] sm:$0xff]  ;;  %v431_v12 = vld [vmem:[%s610_s0 + $0x8] sm:$0xff] }
   0x5   :  { %v434_v10 = vld [vmem:[%s610_s0 + $0x20] sm:$0xff]  ;;  %v433_v13 = vld [vmem:[%s610_s0 + $0x18] sm:$0xff]  ;;  %v435_v14 = vld [vmem:[%s610_s0 + $0x28] sm:$0xff] }
   0x6   :  { %179 = vmatpush.bf16.msra.mxu0 %v444_v1  ;;  %449 = vmatpush.bf16.msra.mxu1 %v444_v1  ;;  %v437_v15 = vld [vmem:[%s610_s0 + $0x38] sm:$0xff]  ;;  %v542_v16 = vld [vmem:[%s609_s2] ss:$0 sm:$0xff] }
   0x7   :  { %450 = vmatpush.bf16.msra.mxu2 %v444_v1  ;;  %451 = vmatpush.bf16.msra.mxu3 %v444_v1 }
   0xa   :  { %180 = vmatpush.bf16.msra.mxu0 %v443_v2  ;;  %452 = vmatpush.bf16.msra.mxu1 %v443_v2 }
   0xb   :  { %453 = vmatpush.bf16.msra.mxu2 %v443_v2  ;;  %454 = vmatpush.bf16.msra.mxu3 %v443_v2 }
   0xe   :  { %181 = vmatpush.bf16.msra.mxu0 %v442_v3  ;;  %455 = vmatpush.bf16.msra.mxu1 %v442_v3 }
   0xf   :  { %456 = vmatpush.bf16.msra.mxu2 %v442_v3  ;;  %457 = vmatpush.bf16.msra.mxu3 %v442_v3 }
  0x12   :  { %182 = vmatpush.bf16.msra.mxu0 %v441_v4  ;;  %458 = vmatpush.bf16.msra.mxu1 %v441_v4 }
  0x13   :  { %459 = vmatpush.bf16.msra.mxu2 %v441_v4  ;;  %460 = vmatpush.bf16.msra.mxu3 %v441_v4 }
  0x16   :  { %183 = vmatpush.bf16.msra.mxu0 %v440_v5  ;;  %461 = vmatpush.bf16.msra.mxu1 %v440_v5 }
  0x17   :  { %462 = vmatpush.bf16.msra.mxu2 %v440_v5  ;;  %463 = vmatpush.bf16.msra.mxu3 %v440_v5 }
  0x1a   :  { %184 = vmatpush.bf16.msra.mxu0 %v439_v6  ;;  %464 = vmatpush.bf16.msra.mxu1 %v439_v6 }
  0x1b   :  { %465 = vmatpush.bf16.msra.mxu2 %v439_v6  ;;  %466 = vmatpush.bf16.msra.mxu3 %v439_v6 }
  0x1e   :  { %185 = vmatpush.bf16.msra.mxu0 %v438_v7  ;;  %467 = vmatpush.bf16.msra.mxu1 %v438_v7 }
  0x1f   :  { %468 = vmatpush.bf16.msra.mxu2 %v438_v7  ;;  %469 = vmatpush.bf16.msra.mxu3 %v438_v7 }
  0x21   :  { %186 = vmatmul.bf16.vlgmr.msra.gmra.mxu0 %v430_v8  ;;  %196 = vmatmul.bf16.vlgmr.msra.gmra.mxu1 %v432_v9 }
  0x22   :  { %206 = vmatmul.bf16.vlgmr.msra.gmra.mxu2 %v434_v10  ;;  %216 = vmatmul.bf16.vlgmr.msra.gmra.mxu3 %v436_v11 }
  0x31   :  { %191 = vmatmul.bf16.gmra.mxu0 %v431_v12  ;;  %201 = vmatmul.bf16.gmra.mxu1 %v433_v13 }
  0x32   :  { %211 = vmatmul.bf16.gmra.mxu2 %v435_v14  ;;  %221 = vmatmul.bf16.gmra.mxu3 %v437_v15 }
  0x9e   :  { %v187_v17 = vpop.f32.mrf.mxu0  ;;  %v197_v18 = vpop.f32.mrf.mxu1 }
  0x9f   :  { %v282_v19 = vadd.f32 %v542_v16, %v187_v17  ;;  %v286_v20 = vadd.f32 %v542_v16, %v197_v18 }
  0xa1   :  { %vm298_vm0 = vcmp.gt.f32.partialorder %v282_v19, 0.0  ;;  %v314_v21 = vmul.f32 0.2, %v282_v19  ;;  %vm302_vm1 = vcmp.gt.f32.partialorder %v286_v20, 0.0  ;;  %v318_v22 = vmul.f32 0.2, %v286_v20 }
  0xa3   :  { %v330_v23 = vsel %vm298_vm0, %v282_v19, %v314_v21  ;;  %v334_v24 = vsel %vm302_vm1, %v286_v20, %v318_v22 }
  0xa4   :  { %346 = vst [vmem:[%s611_s3] sm:$0xff] %v330_v23 }
  0xa5   :  { %350 = vst [vmem:[%s611_s3 + $0x20] sm:$0xff] %v334_v24  ;;  %v207_v25 = vpop.f32.mrf.mxu2  ;;  %v217_v26 = vpop.f32.mrf.mxu3 }
  0xa6   :  { %v290_v27 = vadd.f32 %v542_v16, %v207_v25  ;;  %v294_v28 = vadd.f32 %v542_v16, %v217_v26  ;;  %v189_v29 = vpop.f32.mrf.mxu0  ;;  %v199_v30 = vpop.f32.mrf.mxu1 }
  0xa7   :  { %v283_v31 = vadd.f32 %v542_v16, %v189_v29  ;;  %v287_v32 = vadd.f32 %v542_v16, %v199_v30 }
  0xa8   :  { %vm306_vm2 = vcmp.gt.f32.partialorder %v290_v27, 0.0  ;;  %v322_v33 = vmul.f32 0.2, %v290_v27  ;;  %vm310_vm3 = vcmp.gt.f32.partialorder %v294_v28, 0.0  ;;  %v326_v34 = vmul.f32 0.2, %v294_v28 }
  0xa9   :  { %vm299_vm4 = vcmp.gt.f32.partialorder %v283_v31, 0.0  ;;  %v315_v35 = vmul.f32 0.2, %v283_v31  ;;  %vm303_vm5 = vcmp.gt.f32.partialorder %v287_v32, 0.0  ;;  %v319_v36 = vmul.f32 0.2, %v287_v32 }
  0xaa   :  { %v338_v37 = vsel %vm306_vm2, %v290_v27, %v322_v33  ;;  %v342_v38 = vsel %vm310_vm3, %v294_v28, %v326_v34 }
  0xab   :  { %354 = vst [vmem:[%s611_s3 + $0x40] sm:$0xff] %v338_v37  ;;  %v331_v39 = vsel %vm299_vm4, %v283_v31, %v315_v35  ;;  %v335_v40 = vsel %vm303_vm5, %v287_v32, %v319_v36 }
  0xac   :  { %358 = vst [vmem:[%s611_s3 + $0x60] sm:$0xff] %v342_v38 }
  0xad   :  { %347 = vst [vmem:[%s611_s3 + $0x8] sm:$0xff] %v331_v39  ;;  %v209_v41 = vpop.f32.mrf.mxu2  ;;  %v219_v42 = vpop.f32.mrf.mxu3 }
  0xae   :  { %351 = vst [vmem:[%s611_s3 + $0x28] sm:$0xff] %v335_v40  ;;  %v291_v43 = vadd.f32 %v542_v16, %v209_v41  ;;  %v295_v44 = vadd.f32 %v542_v16, %v219_v42  ;;  %v192_v45 = vpop.f32.mrf.mxu0  ;;  %v202_v46 = vpop.f32.mrf.mxu1 }
  0xaf   :  { %v284_v47 = vadd.f32 %v542_v16, %v192_v45  ;;  %v288_v48 = vadd.f32 %v542_v16, %v202_v46 }
  0xb0   :  { %vm307_vm6 = vcmp.gt.f32.partialorder %v291_v43, 0.0  ;;  %v323_v49 = vmul.f32 0.2, %v291_v43  ;;  %vm311_vm7 = vcmp.gt.f32.partialorder %v295_v44, 0.0  ;;  %v327_v50 = vmul.f32 0.2, %v295_v44 }
  0xb1   :  { %vm300_vm8 = vcmp.gt.f32.partialorder %v284_v47, 0.0  ;;  %v316_v51 = vmul.f32 0.2, %v284_v47  ;;  %vm304_vm9 = vcmp.gt.f32.partialorder %v288_v48, 0.0  ;;  %v320_v52 = vmul.f32 0.2, %v288_v48 }
  0xb2   :  { %v339_v53 = vsel %vm307_vm6, %v291_v43, %v323_v49  ;;  %v343_v54 = vsel %vm311_vm7, %v295_v44, %v327_v50 }
  0xb3   :  { %355 = vst [vmem:[%s611_s3 + $0x48] sm:$0xff] %v339_v53  ;;  %v332_v55 = vsel %vm300_vm8, %v284_v47, %v316_v51  ;;  %v336_v56 = vsel %vm304_vm9, %v288_v48, %v320_v52 }
  0xb4   :  { %359 = vst [vmem:[%s611_s3 + $0x68] sm:$0xff] %v343_v54 }
  0xb5   :  { %348 = vst [vmem:[%s611_s3 + $0x10] sm:$0xff] %v332_v55  ;;  %v212_v57 = vpop.f32.mrf.mxu2  ;;  %v222_v58 = vpop.f32.mrf.mxu3 }
  0xb6   :  { %352 = vst [vmem:[%s611_s3 + $0x30] sm:$0xff] %v336_v56  ;;  %v292_v59 = vadd.f32 %v542_v16, %v212_v57  ;;  %v296_v60 = vadd.f32 %v542_v16, %v222_v58  ;;  %v194_v61 = vpop.f32.mrf.mxu0  ;;  %v204_v62 = vpop.f32.mrf.mxu1 }
  0xb7   :  { %v285_v63 = vadd.f32 %v542_v16, %v194_v61  ;;  %v289_v0 = vadd.f32 %v542_v16, %v204_v62 }
  0xb8   :  { %vm308_vm10 = vcmp.gt.f32.partialorder %v292_v59, 0.0  ;;  %v324_v1 = vmul.f32 0.2, %v292_v59  ;;  %vm312_vm11 = vcmp.gt.f32.partialorder %v296_v60, 0.0  ;;  %v328_v2 = vmul.f32 0.2, %v296_v60 }
  0xb9   :  { %vm301_vm12 = vcmp.gt.f32.partialorder %v285_v63, 0.0  ;;  %v317_v3 = vmul.f32 0.2, %v285_v63  ;;  %vm305_vm13 = vcmp.gt.f32.partialorder %v289_v0, 0.0  ;;  %v321_v4 = vmul.f32 0.2, %v289_v0 }
  0xba   :  { %v340_v5 = vsel %vm308_vm10, %v292_v59, %v324_v1  ;;  %v344_v6 = vsel %vm312_vm11, %v296_v60, %v328_v2 }
  0xbb   :  { %356 = vst [vmem:[%s611_s3 + $0x50] sm:$0xff] %v340_v5  ;;  %v333_v7 = vsel %vm301_vm12, %v285_v63, %v317_v3  ;;  %v337_v8 = vsel %vm305_vm13, %v289_v0, %v321_v4 }
  0xbc   :  { %360 = vst [vmem:[%s611_s3 + $0x70] sm:$0xff] %v344_v6 }
  0xbd   :  { %349 = vst [vmem:[%s611_s3 + $0x18] sm:$0xff] %v333_v7  ;;  %v214_v9 = vpop.f32.mrf.mxu2  ;;  %v224_v10 = vpop.f32.mrf.mxu3 }
  0xbe   :  { %353 = vst [vmem:[%s611_s3 + $0x38] sm:$0xff] %v337_v8  ;;  %v293_v11 = vadd.f32 %v542_v16, %v214_v9  ;;  %v297_v12 = vadd.f32 %v542_v16, %v224_v10 }
  0xc0   :  { %vm309_vm14 = vcmp.gt.f32.partialorder %v293_v11, 0.0  ;;  %v325_v13 = vmul.f32 0.2, %v293_v11  ;;  %vm313_vm15 = vcmp.gt.f32.partialorder %v297_v12, 0.0  ;;  %v329_v14 = vmul.f32 0.2, %v297_v12 }
  0xc2   :  { %v341_v15 = vsel %vm309_vm14, %v293_v11, %v325_v13  ;;  %v345_v17 = vsel %vm313_vm15, %v297_v12, %v329_v14 }
  0xc3   :  { %357 = vst [vmem:[%s611_s3 + $0x58] sm:$0xff] %v341_v15 }
  0xc4   :  { %361 = vst [vmem:[%s611_s3 + $0x78] sm:$0xff] %v345_v17 }

// kernel: discriminator_forward.9
= control target key start
LH: loop header
LB: loop body
LE: loop exit
PB: predicated region body
PF: predicated region fallthrough
CT: control target
= control target key end

     0   :  { %v411_v28 = vmov 0.0   ;;  %s547_s1 = inlined_call_operand.vmem [shape: bf16[256,128], index: 1, kind: input, shape index: {}]   ;;  %s548_s0 = inlined_call_operand.vmem [shape: bf16[32,256], index: 0, kind: input, shape index: {}]   ;;  %s549_s2 = inlined_call_operand.vmem [shape: f32[1,128], index: 2, kind: input, shape index: {}]   ;;  %s550_s4 = inlined_call_operand.vmem [shape: f32[1,128], index: 4, kind: output, shape index: {1}]   ;;  %s551_s5 = inlined_call_operand.vmem [shape: f32[1,128], index: 5, kind: output, shape index: {2}]   ;;  %s552_s3 = inlined_call_operand.vmem [shape: f32[32,128], index: 3, kind: output, shape index: {0}]  }
   0x1   :  { %v384_v0 = vld [vmem:[%s547_s1 + $0x38] sm:$0xff]  ;;  %v383_v2 = vld [vmem:[%s547_s1 + $0x30] sm:$0xff]  ;;  %v382_v4 = vld [vmem:[%s547_s1 + $0x28] sm:$0xff]  ;;  %232 = vst [vmem:[%s550_s4] sm:$0x1] %v411_v28 }
   0x2   :  { %v392_v1 = vld [vmem:[%s547_s1 + $0x78] sm:$0xff]  ;;  %181 = vmatpush.bf16.msra.mxu0 %v384_v0  ;;  %393 = vmatpush.bf16.msra.mxu2 %v384_v0  ;;  %v391_v3 = vld [vmem:[%s547_s1 + $0x70] sm:$0xff]  ;;  %v390_v5 = vld [vmem:[%s547_s1 + $0x68] sm:$0xff]  ;;  %233 = vst [vmem:[%s551_s5] sm:$0x1] %v411_v28 }
   0x3   :  { %200 = vmatpush.bf16.msra.mxu1 %v392_v1  ;;  %401 = vmatpush.bf16.msra.mxu3 %v392_v1  ;;  %v381_v6 = vld [vmem:[%s547_s1 + $0x20] sm:$0xff]  ;;  %v380_v8 = vld [vmem:[%s547_s1 + $0x18] sm:$0xff]  ;;  %v379_v10 = vld [vmem:[%s547_s1 + $0x10] sm:$0xff] }
   0x4   :  { %v389_v7 = vld [vmem:[%s547_s1 + $0x60] sm:$0xff]  ;;  %v388_v9 = vld [vmem:[%s547_s1 + $0x58] sm:$0xff]  ;;  %v387_v11 = vld [vmem:[%s547_s1 + $0x50] sm:$0xff] }
   0x5   :  { %v378_v12 = vld [vmem:[%s547_s1 + $0x8] sm:$0xff]  ;;  %v377_v14 = vld [vmem:[%s547_s1] sm:$0xff]  ;;  %v303_v18 = vld [vmem:[%s548_s0 + $0x10] sm:$0xf] }
   0x6   :  { %182 = vmatpush.bf16.msra.mxu0 %v383_v2  ;;  %394 = vmatpush.bf16.msra.mxu2 %v383_v2  ;;  %v386_v13 = vld [vmem:[%s547_s1 + $0x48] sm:$0xff]  ;;  %v385_v15 = vld [vmem:[%s547_s1 + $0x40] sm:$0xff]  ;;  %v376_v19 = vld [vmem:[%s548_s0 + $0x14] sm:$0xf0] }
   0x7   :  { %201 = vmatpush.bf16.msra.mxu1 %v391_v3  ;;  %402 = vmatpush.bf16.msra.mxu3 %v391_v3  ;;  %v295_v16 = vld [vmem:[%s548_s0] sm:$0xf]  ;;  %v374_v17 = vld [vmem:[%s548_s0 + $0x4] sm:$0xf0]  ;;  %v373_v20 = vld [vmem:[%s548_s0 + $0x4] sm:$0xf]  ;;  %v304_v25 = vor.u32 %v376_v19, %v303_v18 }
   0x8   :  { %v297_v21 = vld [vmem:[%s548_s0 + $0x8] sm:$0xf0]  ;;  %v375_v22 = vld [vmem:[%s548_s0 + $0x14] sm:$0xf]  ;;  %v305_v23 = vld [vmem:[%s548_s0 + $0x18] sm:$0xf0]  ;;  %v296_v24 = vor.u32 %v374_v17, %v295_v16 }
   0x9   :  { %v300_v26 = vor.u32 %v373_v20, %v297_v21  ;;  %v308_v27 = vor.u32 %v375_v22, %v305_v23  ;;  %v410_v30 = vld [vmem:[%s549_s2] ss:$0 sm:$0xff] }
   0xa   :  { %183 = vmatpush.bf16.msra.mxu0 %v382_v4  ;;  %395 = vmatpush.bf16.msra.mxu2 %v382_v4  ;;  %v253_v1 = vld [vmem:[%s550_s4] sm:$0x1] }
   0xb   :  { %202 = vmatpush.bf16.msra.mxu1 %v390_v5  ;;  %403 = vmatpush.bf16.msra.mxu3 %v390_v5  ;;  %v265_v4 = vld [vmem:[%s551_s5] sm:$0x1] }
   0xe   :  { %184 = vmatpush.bf16.msra.mxu0 %v381_v6  ;;  %396 = vmatpush.bf16.msra.mxu2 %v381_v6 }
   0xf   :  { %203 = vmatpush.bf16.msra.mxu1 %v389_v7  ;;  %404 = vmatpush.bf16.msra.mxu3 %v389_v7 }
  0x12   :  { %185 = vmatpush.bf16.msra.mxu0 %v380_v8  ;;  %397 = vmatpush.bf16.msra.mxu2 %v380_v8 }
  0x13   :  { %204 = vmatpush.bf16.msra.mxu1 %v388_v9  ;;  %405 = vmatpush.bf16.msra.mxu3 %v388_v9 }
  0x16   :  { %186 = vmatpush.bf16.msra.mxu0 %v379_v10  ;;  %398 = vmatpush.bf16.msra.mxu2 %v379_v10 }
  0x17   :  { %205 = vmatpush.bf16.msra.mxu1 %v387_v11  ;;  %406 = vmatpush.bf16.msra.mxu3 %v387_v11 }
  0x1a   :  { %187 = vmatpush.bf16.msra.mxu0 %v378_v12  ;;  %399 = vmatpush.bf16.msra.mxu2 %v378_v12 }
  0x1b   :  { %206 = vmatpush.bf16.msra.mxu1 %v386_v13  ;;  %407 = vmatpush.bf16.msra.mxu3 %v386_v13 }
  0x1e   :  { %188 = vmatpush.bf16.msra.mxu0 %v377_v14  ;;  %400 = vmatpush.bf16.msra.mxu2 %v377_v14 }
  0x1f   :  { %207 = vmatpush.bf16.msra.mxu1 %v385_v15  ;;  %408 = vmatpush.bf16.msra.mxu3 %v385_v15 }
  0x21   :  { %189 = vmatmul.bf16.vlgmr.msra.gmra.mxu0 %v296_v24  ;;  %194 = vmatmul.bf16.vlgmr.msra.gmra.mxu2 %v304_v25 }
  0x22   :  { %208 = vmatmul.bf16.vlgmr.msra.gmra.mxu1 %v300_v26  ;;  %213 = vmatmul.bf16.vlgmr.msra.gmra.mxu3 %v308_v27 }
  0x9e   :  { %v190_v29 = vpop.f32.mrf.mxu0 }
  0x9f   :  { %v209_v31 = vpop.f32.mrf.mxu1 }
  0xa0   :  { %v210_v32 = vadd.f32 %v209_v31, %v190_v29 }
  0xa2   :  { %v245_v33 = vadd.f32 %v410_v30, %v210_v32 }
  0xa4   :  { %249 = vst [vmem:[%s552_s3] sm:$0xff] %v245_v33  ;;  %v195_v34 = vpop.f32.mrf.mxu2  ;;  %v266_v42 = vmul.f32 %v245_v33, %v245_v33 }
  0xa5   :  { %v214_v35 = vpop.f32.mrf.mxu3 }
  0xa6   :  { %v215_v36 = vadd.f32 %v214_v35, %v195_v34  ;;  %v192_v37 = vpop.f32.mrf.mxu0 }
  0xa7   :  { %v211_v38 = vpop.f32.mrf.mxu1 }
  0xa8   :  { %v247_v39 = vadd.f32 %v410_v30, %v215_v36  ;;  %v212_v40 = vadd.f32 %v211_v38, %v192_v37 }
  0xaa   :  { %251 = vst [vmem:[%s552_s3 + $0x10] sm:$0xff] %v247_v39  ;;  %v246_v41 = vadd.f32 %v410_v30, %v212_v40  ;;  %v268_v49 = vmul.f32 %v247_v39, %v247_v39 }
  0xac   :  { %250 = vst [vmem:[%s552_s3 + $0x8] sm:$0xff] %v246_v41  ;;  %v254_v43 = vadd.f32 %v246_v41, %v245_v33  ;;  %v267_v44 = vmul.f32 %v246_v41, %v246_v41  ;;  %v197_v45 = vpop.f32.mrf.mxu2 }
  0xad   :  { %v216_v46 = vpop.f32.mrf.mxu3 }
  0xae   :  { %v270_v47 = vadd.f32 %v267_v44, %v266_v42  ;;  %v217_v48 = vadd.f32 %v216_v46, %v197_v45  ;;  %v255_v51 = vadd.f32 %v254_v43, %v247_v39 }
  0xb0   :  { %v248_v50 = vadd.f32 %v410_v30, %v217_v48  ;;  %v271_v54 = vadd.f32 %v270_v47, %v268_v49 }
  0xb2   :  { %252 = vst [vmem:[%s552_s3 + $0x18] sm:$0xff] %v248_v50  ;;  %v256_v52 = vadd.f32 %v255_v51, %v248_v50  ;;  %v269_v53 = vmul.f32 %v248_v50, %v248_v50 }
  0xb4   :  { %v257_v55 = vrot.slane %v256_v52, 4  ;;  %v272_v56 = vadd.f32 %v271_v54, %v269_v53 }
  0xb6   :  { %v258_v57 = vadd.f32 %v257_v55, %v256_v52  ;;  %v273_v58 = vrot.slane %v272_v56, 4 }
  0xb8   :  { %v259_v59 = vrot.slane %v258_v57, 2  ;;  %v274_v60 = vadd.f32 %v273_v58, %v272_v56 }
  0xba   :  { %v260_v61 = vadd.f32 %v259_v59, %v258_v57  ;;  %v275_v62 = vrot.slane %v274_v60, 2 }
  0xbc   :  { %v261_v63 = vrot.slane %v260_v61, 1  ;;  %v276_v0 = vadd.f32 %v275_v62, %v274_v60 }
  0xbe   :  { %v262_v2 = vadd.f32 %v261_v63, %v260_v61  ;;  %v277_v3 = vrot.slane %v276_v0, 1 }
  0xc0   :  { %v263_v5 = vadd.f32 %v262_v2, %v253_v1  ;;  %v278_v6 = vadd.f32 %v277_v3, %v276_v0 }
  0xc2   :  { %264 = vst [vmem:[%s550_s4] sm:$0x1] %v263_v5  ;;  %v279_v7 = vadd.f32 %v278_v6, %v265_v4 }
  0xc4   :  { %280 = vst [vmem:[%s551_s5] sm:$0x1] %v279_v7 }

// kernel: discriminator_forward.10
= control target key start
LH: loop header
LB: loop body
LE: loop exit
PB: predicated region body
PF: predicated region fallthrough
CT: control target
= control target key end

     0   :  { %s155_s1 = inlined_call_operand.vmem [shape: f32[1,128], index: 1, kind: input, shape index: {}]   ;;  %s156_s2 = inlined_call_operand.vmem [shape: f32[1,128], index: 2, kind: input, shape index: {}]   ;;  %s157_s4 = inlined_call_operand.vmem [shape: f32[1,128], index: 4, kind: input, shape index: {}]   ;;  %s158_s0 = inlined_call_operand.vmem [shape: f32[32,128], index: 0, kind: input, shape index: {}]   ;;  %s159_s3 = inlined_call_operand.vmem [shape: f32[1,128], index: 3, kind: input, shape index: {}]   ;;  %s160_s5 = inlined_call_operand.vmem [shape: f32[32,128], index: 5, kind: output, shape index: {}]  }
   0x1   :  { %v20_v0 = vld [vmem:[%s155_s1] sm:$0x1]  ;;  %v41_v17 = vld [vmem:[%s158_s0 + $0x8] sm:$0xff]  ;;  %v42_v18 = vld [vmem:[%s158_s0 + $0x10] sm:$0xff] }
   0x2   :  { %v22_v1 = vld [vmem:[%s156_s2] sm:$0x1]  ;;  %v21_v2 = vmul.f32 0.03125, %v20_v0  ;;  %v43_v19 = vld [vmem:[%s158_s0 + $0x18] sm:$0xff] }
   0x3   :  { %v23_v3 = vmul.f32 0.03125, %v22_v1  ;;  %v38_v14 = vld [vmem:[%s159_s3] sm:$0x1] }
   0x4   :  { %v24_v4 = vmul.f32 %v21_v2, %v21_v2  ;;  %v45_v13 = vperm.slane %v21_v2, 0  ;;  %v40_v15 = vld [vmem:[%s158_s0] sm:$0xff] }
   0x5   :  { %v86_v27 = vld [vmem:[%s157_s4] ss:$0 sm:$0xff] }
   0x6   :  { %v25_v5 = vsub.f32 %v23_v3, %v24_v4  ;;  %v47_v21 = vsub.f32 %v40_v15, %v45_v13  ;;  %v48_v23 = vsub.f32 %v41_v17, %v45_v13  ;;  %v49_v24 = vsub.f32 %v42_v18, %v45_v13 }
   0x7   :  { %v50_v25 = vsub.f32 %v43_v19, %v45_v13 }
   0x8   :  { %v26_v6 = vmax.f32 %v25_v5, 0.0 }
   0xa   :  { %v27_v7 = vadd.f32 1e-05, %v26_v6 }
   0xc   :  { %87 = vrsqrt.f32 %v27_v7  ;;  %vm34_vm0 = vweird.f32 %v27_v7 }
  0x12   :  { %v88_v8 = vpop.eup %87 }
  0x13   :  { %v29_v9 = vmul.f32 %v88_v8, %v27_v7  ;;  %vm35_vm1 = vweird.f32 %v88_v8 }
  0x14   :  { %vm36_vm2 = vmor %vm34_vm0, %vm35_vm1 }
  0x15   :  { %v30_v10 = vmul.f32 %v88_v8, %v29_v9 }
  0x17   :  { %v31_v11 = vmul.f32 0.5, %v30_v10 }
  0x19   :  { %v32_v12 = vsub.f32 1.5, %v31_v11 }
  0x1b   :  { %v33_v16 = vmul.f32 %v88_v8, %v32_v12 }
  0x1d   :  { %v37_v20 = vsel %vm36_vm2, %v88_v8, %v33_v16 }
  0x1e   :  { %v39_v22 = vmul.f32 %v38_v14, %v37_v20 }
  0x20   :  { %v52_v26 = vperm.slane %v39_v22, 0 }
  0x22   :  { %v54_v28 = vmul.f32 %v52_v26, %v47_v21  ;;  %v55_v29 = vmul.f32 %v52_v26, %v48_v23  ;;  %v56_v30 = vmul.f32 %v52_v26, %v49_v24  ;;  %v57_v31 = vmul.f32 %v52_v26, %v50_v25 }
  0x24   :  { %v62_v32 = vadd.f32 %v86_v27, %v54_v28  ;;  %v63_v33 = vadd.f32 %v86_v27, %v55_v29  ;;  %v64_v34 = vadd.f32 %v86_v27, %v56_v30  ;;  %v65_v35 = vadd.f32 %v86_v27, %v57_v31 }
  0x26   :  { %vm66_vm3 = vcmp.gt.f32.partialorder %v62_v32, 0.0  ;;  %v70_v36 = vmul.f32 0.2, %v62_v32  ;;  %vm67_vm4 = vcmp.gt.f32.partialorder %v63_v33, 0.0  ;;  %v71_v37 = vmul.f32 0.2, %v63_v33 }
  0x27   :  { %vm68_vm5 = vcmp.gt.f32.partialorder %v64_v34, 0.0  ;;  %v72_v38 = vmul.f32 0.2, %v64_v34  ;;  %vm69_vm6 = vcmp.gt.f32.partialorder %v65_v35, 0.0  ;;  %v73_v39 = vmul.f32 0.2, %v65_v35 }
  0x28   :  { %v74_v40 = vsel %vm66_vm3, %v62_v32, %v70_v36  ;;  %v75_v41 = vsel %vm67_vm4, %v63_v33, %v71_v37 }
  0x29   :  { %78 = vst [vmem:[%s160_s5] sm:$0xff] %v74_v40  ;;  %v76_v42 = vsel %vm68_vm5, %v64_v34, %v72_v38  ;;  %v77_v43 = vsel %vm69_vm6, %v65_v35, %v73_v39 }
  0x2a   :  { %79 = vst [vmem:[%s160_s5 + $0x8] sm:$0xff] %v75_v41 }
  0x2b   :  { %80 = vst [vmem:[%s160_s5 + $0x10] sm:$0xff] %v76_v42 }
  0x2c   :  { %81 = vst [vmem:[%s160_s5 + $0x18] sm:$0xff] %v77_v43 }

// kernel: discriminator_forward.12
= control target key start
LH: loop header
LB: loop body
LE: loop exit
PB: predicated region body
PF: predicated region fallthrough
CT: control target
= control target key end

     0   :  { %s113_s1 = inlined_call_operand.vmem [shape: f32[1,128], index: 1, kind: input, shape index: {}]   ;;  %s114_s2 = inlined_call_operand.vmem [shape: f32[1,128], index: 2, kind: input, shape index: {}]   ;;  %s115_s4 = inlined_call_operand.vmem [shape: f32[1,128], index: 4, kind: input, shape index: {}]   ;;  %s116_s0 = inlined_call_operand.vmem [shape: f32[8,128], index: 0, kind: input, shape index: {}]   ;;  %s117_s3 = inlined_call_operand.vmem [shape: f32[1,128], index: 3, kind: input, shape index: {}]   ;;  %s118_s5 = inlined_call_operand.vmem [shape: f32[8,128], index: 5, kind: output, shape index: {}]  }
   0x1   :  { %v20_v0 = vld [vmem:[%s113_s1] sm:$0x1] }
   0x2   :  { %v22_v1 = vld [vmem:[%s114_s2] sm:$0x1]  ;;  %v21_v2 = vmul.f32 0.125, %v20_v0 }
   0x3   :  { %v23_v3 = vmul.f32 0.125, %v22_v1  ;;  %v38_v15 = vld [vmem:[%s117_s3] sm:$0x1] }
   0x4   :  { %v24_v4 = vmul.f32 %v21_v2, %v21_v2  ;;  %v42_v13 = vperm.slane %v21_v2, 0  ;;  %v40_v16 = vld [vmem:[%s116_s0] sm:$0xff] }
   0x5   :  { %v62_v21 = vld [vmem:[%s115_s4] ss:$0 sm:$0xff] }
   0x6   :  { %v25_v5 = vsub.f32 %v23_v3, %v24_v4  ;;  %v44_v19 = vsub.f32 %v40_v16, %v42_v13 }
   0x8   :  { %v26_v6 = vmax.f32 %v25_v5, 0.0 }
   0xa   :  { %v27_v7 = vadd.f32 1e-05, %v26_v6 }
   0xc   :  { %63 = vrsqrt.f32 %v27_v7  ;;  %vm34_vm0 = vweird.f32 %v27_v7 }
  0x12   :  { %v64_v8 = vpop.eup %63 }
  0x13   :  { %v29_v9 = vmul.f32 %v64_v8, %v27_v7  ;;  %vm35_vm1 = vweird.f32 %v64_v8 }
  0x14   :  { %vm36_vm2 = vmor %vm34_vm0, %vm35_vm1 }
  0x15   :  { %v30_v10 = vmul.f32 %v64_v8, %v29_v9 }
  0x17   :  { %v31_v11 = vmul.f32 0.5, %v30_v10 }
  0x19   :  { %v32_v12 = vsub.f32 1.5, %v31_v11 }
  0x1b   :  { %v33_v14 = vmul.f32 %v64_v8, %v32_v12 }
  0x1d   :  { %v37_v17 = vsel %vm36_vm2, %v64_v8, %v33_v14 }
  0x1e   :  { %v39_v18 = vmul.f32 %v38_v15, %v37_v17 }
  0x20   :  { %v46_v20 = vperm.slane %v39_v18, 0 }
  0x22   :  { %v48_v22 = vmul.f32 %v46_v20, %v44_v19 }
  0x24   :  { %v53_v23 = vadd.f32 %v62_v21, %v48_v22 }
  0x26   :  { %vm54_vm3 = vcmp.gt.f32.partialorder %v53_v23, 0.0  ;;  %v55_v24 = vmul.f32 0.2, %v53_v23 }
  0x28   :  { %v56_v25 = vsel %vm54_vm3, %v53_v23, %v55_v24 }
  0x29   :  { %57 = vst [vmem:[%s118_s5] sm:$0xff] %v56_v25 }

// kernel: discriminator_forward.11
= control target key start
LH: loop header
LB: loop body
LE: loop exit
PB: predicated region body
PF: predicated region fallthrough
CT: control target
= control target key end

     0   :  { %v559_v42 = vmov 0.0   ;;  %s716_s1 = inlined_call_operand.vmem [shape: bf16[512,128], index: 1, kind: input, shape index: {}]   ;;  %s717_s0 = inlined_call_operand.vmem [shape: bf16[8,512], index: 0, kind: input, shape index: {}]   ;;  %s718_s2 = inlined_call_operand.vmem [shape: f32[1,128], index: 2, kind: input, shape index: {}]   ;;  %s719_s4 = inlined_call_operand.vmem [shape: f32[1,128], index: 4, kind: output, shape index: {1}]   ;;  %s720_s5 = inlined_call_operand.vmem [shape: f32[1,128], index: 5, kind: output, shape index: {2}]   ;;  %s721_s3 = inlined_call_operand.vmem [shape: f32[8,128], index: 3, kind: output, shape index: {0}]  }
   0x1   :  { %v532_v0 = vld [vmem:[%s716_s1 + $0x38] sm:$0xff]  ;;  %v531_v4 = vld [vmem:[%s716_s1 + $0x30] sm:$0xff]  ;;  %v530_v8 = vld [vmem:[%s716_s1 + $0x28] sm:$0xff]  ;;  %354 = vst [vmem:[%s719_s4] sm:$0x1] %v559_v42 }
   0x2   :  { %v540_v1 = vld [vmem:[%s716_s1 + $0x78] sm:$0xff]  ;;  %295 = vmatpush.bf16.msra.mxu0 %v532_v0  ;;  %v539_v5 = vld [vmem:[%s716_s1 + $0x70] sm:$0xff]  ;;  %v538_v9 = vld [vmem:[%s716_s1 + $0x68] sm:$0xff]  ;;  %355 = vst [vmem:[%s720_s5] sm:$0x1] %v559_v42 }
   0x3   :  { %v548_v2 = vld [vmem:[%s716_s1 + $0xb8] sm:$0xff]  ;;  %308 = vmatpush.bf16.msra.mxu1 %v540_v1  ;;  %v547_v6 = vld [vmem:[%s716_s1 + $0xb0] sm:$0xff]  ;;  %v546_v10 = vld [vmem:[%s716_s1 + $0xa8] sm:$0xff] }
   0x4   :  { %v556_v3 = vld [vmem:[%s716_s1 + $0xf8] sm:$0xff]  ;;  %321 = vmatpush.bf16.msra.mxu2 %v548_v2  ;;  %v555_v7 = vld [vmem:[%s716_s1 + $0xf0] sm:$0xff]  ;;  %v554_v11 = vld [vmem:[%s716_s1 + $0xe8] sm:$0xff] }
   0x5   :  { %334 = vmatpush.bf16.msra.mxu3 %v556_v3  ;;  %v529_v12 = vld [vmem:[%s716_s1 + $0x20] sm:$0xff]  ;;  %v528_v16 = vld [vmem:[%s716_s1 + $0x18] sm:$0xff]  ;;  %v527_v20 = vld [vmem:[%s716_s1 + $0x10] sm:$0xff] }
   0x6   :  { %296 = vmatpush.bf16.msra.mxu0 %v531_v4  ;;  %v537_v13 = vld [vmem:[%s716_s1 + $0x60] sm:$0xff]  ;;  %v536_v17 = vld [vmem:[%s716_s1 + $0x58] sm:$0xff]  ;;  %v535_v21 = vld [vmem:[%s716_s1 + $0x50] sm:$0xff] }
   0x7   :  { %309 = vmatpush.bf16.msra.mxu1 %v539_v5  ;;  %v545_v14 = vld [vmem:[%s716_s1 + $0xa0] sm:$0xff]  ;;  %v544_v18 = vld [vmem:[%s716_s1 + $0x98] sm:$0xff]  ;;  %v543_v22 = vld [vmem:[%s716_s1 + $0x90] sm:$0xff] }
   0x8   :  { %322 = vmatpush.bf16.msra.mxu2 %v547_v6  ;;  %v553_v15 = vld [vmem:[%s716_s1 + $0xe0] sm:$0xff]  ;;  %v552_v19 = vld [vmem:[%s716_s1 + $0xd8] sm:$0xff]  ;;  %v551_v23 = vld [vmem:[%s716_s1 + $0xd0] sm:$0xff] }
   0x9   :  { %335 = vmatpush.bf16.msra.mxu3 %v555_v7  ;;  %v526_v24 = vld [vmem:[%s716_s1 + $0x8] sm:$0xff]  ;;  %v23_v26 = vld [vmem:[%s717_s0] sm:$0xff] }
   0xa   :  { %297 = vmatpush.bf16.msra.mxu0 %v530_v8  ;;  %v534_v25 = vld [vmem:[%s716_s1 + $0x48] sm:$0xff]  ;;  %v91_v30 = vunpack.c.l.b16 %v23_v26  ;;  %v92_v31 = vunpack.c.h.b16 %v23_v26  ;;  %v525_v32 = vld [vmem:[%s716_s1] sm:$0xff] }
   0xb   :  { %310 = vmatpush.bf16.msra.mxu1 %v538_v9  ;;  %v542_v27 = vld [vmem:[%s716_s1 + $0x88] sm:$0xff]  ;;  %v533_v33 = vld [vmem:[%s716_s1 + $0x40] sm:$0xff] }
   0xc   :  { %323 = vmatpush.bf16.msra.mxu2 %v546_v10  ;;  %v550_v28 = vld [vmem:[%s716_s1 + $0xc8] sm:$0xff]  ;;  %v541_v36 = vld [vmem:[%s716_s1 + $0x80] sm:$0xff]  ;;  %v95_v38 = vpack.c.b16 %v91_v30, %v91_v30  ;;  %v96_v39 = vpack.c.b16 %v92_v31, %v92_v31 }
   0xd   :  { %336 = vmatpush.bf16.msra.mxu3 %v554_v11  ;;  %v24_v29 = vld [vmem:[%s717_s0 + $0x8] sm:$0xff]  ;;  %v549_v37 = vld [vmem:[%s716_s1 + $0xc0] sm:$0xff] }
   0xe   :  { %298 = vmatpush.bf16.msra.mxu0 %v529_v12  ;;  %v93_v34 = vunpack.c.l.b16 %v24_v29  ;;  %v94_v35 = vunpack.c.h.b16 %v24_v29  ;;  %v558_v49 = vld [vmem:[%s718_s2] ss:$0 sm:$0xff] }
   0xf   :  { %311 = vmatpush.bf16.msra.mxu1 %v537_v13  ;;  %v366_v2 = vld [vmem:[%s719_s4] sm:$0x1] }
  0x10   :  { %324 = vmatpush.bf16.msra.mxu2 %v545_v14  ;;  %v97_v40 = vpack.c.b16 %v93_v34, %v93_v34  ;;  %v98_v41 = vpack.c.b16 %v94_v35, %v94_v35  ;;  %v375_v5 = vld [vmem:[%s720_s5] sm:$0x1] }
  0x11   :  { %337 = vmatpush.bf16.msra.mxu3 %v553_v15 }
  0x12   :  { %299 = vmatpush.bf16.msra.mxu0 %v528_v16 }
  0x13   :  { %312 = vmatpush.bf16.msra.mxu1 %v536_v17 }
  0x14   :  { %325 = vmatpush.bf16.msra.mxu2 %v544_v18 }
  0x15   :  { %338 = vmatpush.bf16.msra.mxu3 %v552_v19 }
  0x16   :  { %300 = vmatpush.bf16.msra.mxu0 %v527_v20 }
  0x17   :  { %313 = vmatpush.bf16.msra.mxu1 %v535_v21 }
  0x18   :  { %326 = vmatpush.bf16.msra.mxu2 %v543_v22 }
  0x19   :  { %339 = vmatpush.bf16.msra.mxu3 %v551_v23 }
  0x1a   :  { %301 = vmatpush.bf16.msra.mxu0 %v526_v24 }
  0x1b   :  { %314 = vmatpush.bf16.msra.mxu1 %v534_v25 }
  0x1c   :  { %327 = vmatpush.bf16.msra.mxu2 %v542_v27 }
  0x1d   :  { %340 = vmatpush.bf16.msra.mxu3 %v550_v28 }
  0x1e   :  { %302 = vmatpush.bf16.msra.mxu0 %v525_v32 }
  0x1f   :  { %315 = vmatpush.bf16.msra.mxu1 %v533_v33 }
  0x20   :  { %328 = vmatpush.bf16.msra.mxu2 %v541_v36 }
  0x21   :  { %341 = vmatpush.bf16.msra.mxu3 %v549_v37  ;;  %303 = vmatmul.bf16.vlgmr.msra.gmra.mxu0 %v95_v38 }
  0x22   :  { %316 = vmatmul.bf16.vlgmr.msra.gmra.mxu1 %v96_v39 }
  0x23   :  { %329 = vmatmul.bf16.vlgmr.msra.gmra.mxu2 %v97_v40 }
  0x24   :  { %342 = vmatmul.bf16.vlgmr.msra.gmra.mxu3 %v98_v41 }
  0x9e   :  { %v304_v43 = vpop.f32.mrf.mxu0 }
  0x9f   :  { %v317_v44 = vpop.f32.mrf.mxu1 }
  0xa0   :  { %v318_v45 = vadd.f32 %v317_v44, %v304_v43 }
  0xa6   :  { %v330_v46 = vpop.f32.mrf.mxu2  ;;  %v306_v50 = vpop.f32.mrf.mxu0 }
  0xa7   :  { %v343_v47 = vpop.f32.mrf.mxu3  ;;  %v331_v48 = vadd.f32 %v330_v46, %v318_v45  ;;  %v319_v51 = vpop.f32.mrf.mxu1 }
  0xa9   :  { %v344_v52 = vadd.f32 %v343_v47, %v331_v48 }
  0xab   :  { %v364_v53 = vadd.f32 %v558_v49, %v344_v52 }
  0xad   :  { %365 = vst [vmem:[%s721_s3] sm:$0xff] %v364_v53  ;;  %v367_v54 = vrot.slane %v364_v53, 4  ;;  %v376_v55 = vmul.f32 %v364_v53, %v364_v53 }
  0xae   :  { %v332_v56 = vpop.f32.mrf.mxu2 }
  0xaf   :  { %v345_v57 = vpop.f32.mrf.mxu3  ;;  %v368_v58 = vadd.f32 %v367_v54, %v364_v53  ;;  %v377_v59 = vrot.slane %v376_v55, 4 }
  0xb1   :  { %v369_v60 = vrot.slane %v368_v58, 2  ;;  %v378_v61 = vadd.f32 %v377_v59, %v376_v55 }
  0xb3   :  { %v370_v62 = vadd.f32 %v369_v60, %v368_v58  ;;  %v379_v63 = vrot.slane %v378_v61, 2 }
  0xb5   :  { %v371_v0 = vrot.slane %v370_v62, 1  ;;  %v380_v1 = vadd.f32 %v379_v63, %v378_v61 }
  0xb7   :  { %v372_v3 = vadd.f32 %v371_v0, %v370_v62  ;;  %v381_v4 = vrot.slane %v380_v1, 1 }
  0xb9   :  { %v373_v6 = vadd.f32 %v372_v3, %v366_v2  ;;  %v382_v7 = vadd.f32 %v381_v4, %v380_v1 }
  0xbb   :  { %374 = vst [vmem:[%s719_s4] sm:$0x1] %v373_v6  ;;  %v383_v8 = vadd.f32 %v382_v7, %v375_v5 }
  0xbd   :  { %384 = vst [vmem:[%s720_s5] sm:$0x1] %v383_v8 }

// kernel: discriminator_forward.13
= control target key start
LH: loop header
LB: loop body
LE: loop exit
PB: predicated region body
PF: predicated region fallthrough
CT: control target
= control target key end

     0   :  { %s1121_s18 = smov 0   ;;  %s1123_s19 = smov 0   ;;  %s1225_s0 = inlined_call_operand.vmem [shape: bf16[8,1024], index: 0, kind: input, shape index: {}]   ;;  %s1226_s1 = inlined_call_operand.vmem [shape: bf16[1024,128], index: 1, kind: input, shape index: {}]   ;;  %s1227_s2 = inlined_call_operand.vmem [shape: f32[1,128], index: 2, kind: input, shape index: {}]   ;;  %s1228_s3 = inlined_call_operand.vmem [shape: f32[8,128], index: 3, kind: output, shape index: {0}]   ;;  %s1229_s4 = inlined_call_operand.vmem [shape: f32[1,128], index: 4, kind: output, shape index: {1}]   ;;  %s1230_s5 = inlined_call_operand.vmem [shape: f32[1,128], index: 5, kind: output, shape index: {2}]  }
   0x1   :  { %s1125_s20 = smov 0  }
   0x2 LB: > { %s28_s21 = sadd.s32 1, %s1082_s19  ;;  %p861_p0 = scmp.ge.s32.totalorder %s1086_s20, 1  ;;  %s1086_s20 = sphi %s1125_s20, %s16_s20   ;;  %s1082_s19 = sphi %s1123_s19, %s1232_s19   ;;  %s1078_s18 = sphi %s1121_s18, %s1231_s18  }
   0x3   : > { %p29_p1 = scmp.ge.s32.totalorder %s28_s21, 2  ;;  %p244_p2 = scmp.lt.s32.totalorder %s1086_s20, 3 }
   0x5   : > { %s1234_s21 = smov (%p29_p1, %s28_s21), 0  ;;  %p245_p3 = pnand %p861_p0, %p244_p2 }
   0x6   : > { %s862_s22 = sshll.u32 (!%p245_p3), %s1078_s18, 2  ;;  %s864_s23 = sshll.u32 (!%p245_p3), %s1078_s18, 6 }
   0x7   : > { %248 = sbr.rel (%p245_p3) target bundleno = 229 (0xe5), region = 32  ;;  %p298_p4 = scmp.lt.s32.totalorder (!%p245_p3), %s862_s22, 7 }
   0x8   : > { %p306_p5 = scmp.lt.s32.totalorder (!%p245_p3), %s864_s23, 127  ;;  %p330_p6 = scmp.eq.s32.totalorder (!%p245_p3), %s1078_s18, 1 }
   0x9   : > { %p866_p7 = scmp.ne.s32.totalorder (!%p245_p3), %s1078_s18, 0 }
   0xc   : > { %s1236_s22 = smov (!%p298_p4, %s862_s22), 7  ;;  %s1238_s23 = smov (!%p306_p5, %s864_s23), 127 }
   0xd   : > { %s863_s24 = sshll.u32 %s1236_s22, 2  ;;  %s865_s28 = sshll.u32 %s1238_s23, 2 }
   0xe   : > { %s1147_s27 = scalar_lea.vmem %s1225_s0, %s863_s24  ;;  %s1152_s6 = scalar_lea.vmem %s1226_s1, %s865_s28 }
   0xf   : > { %334 = sbr.rel (%p866_p7) target bundleno = 22 (0x16), region = 36 }
  0x14   : > { %v1088_v0 = vmov 0.0  }
  0x15   : > { %335 = vst [vmem:[#allocation2] sm:$0xff] %v1088_v0 }
  0x16 PF: > { %v1010_v1 = vld [vmem:[%s1152_s6 + $0x38] sm:$0xff]  ;;  %v1009_v5 = vld [vmem:[%s1152_s6 + $0x30] sm:$0xff]  ;;  %v1008_v9 = vld [vmem:[%s1152_s6 + $0x28] sm:$0xff]  ;;  %v1089_v56 = vmov (%p330_p6), 0.0  }
  0x17   : > { %v1018_v2 = vld [vmem:[%s1152_s6 + $0x78] sm:$0xff]  ;;  %609 = vmatpush.bf16.msra.mxu0 %v1010_v1  ;;  %v1017_v6 = vld [vmem:[%s1152_s6 + $0x70] sm:$0xff]  ;;  %v1016_v10 = vld [vmem:[%s1152_s6 + $0x68] sm:$0xff]  ;;  %668 = vst [vmem:[%s1229_s4] sm:$0x1] (%p330_p6), %v1089_v56 }
  0x18   : > { %v1026_v3 = vld [vmem:[%s1152_s6 + $0xb8] sm:$0xff]  ;;  %622 = vmatpush.bf16.msra.mxu1 %v1018_v2  ;;  %v1025_v7 = vld [vmem:[%s1152_s6 + $0xb0] sm:$0xff]  ;;  %v1024_v11 = vld [vmem:[%s1152_s6 + $0xa8] sm:$0xff]  ;;  %669 = vst [vmem:[%s1230_s5] sm:$0x1] (%p330_p6), %v1089_v56 }
  0x19   : > { %v1034_v4 = vld [vmem:[%s1152_s6 + $0xf8] sm:$0xff]  ;;  %635 = vmatpush.bf16.msra.mxu2 %v1026_v3  ;;  %v1033_v8 = vld [vmem:[%s1152_s6 + $0xf0] sm:$0xff]  ;;  %v1032_v12 = vld [vmem:[%s1152_s6 + $0xe8] sm:$0xff] }
  0x1a   : > { %648 = vmatpush.bf16.msra.mxu3 %v1034_v4  ;;  %v1007_v13 = vld [vmem:[%s1152_s6 + $0x20] sm:$0xff]  ;;  %v1006_v17 = vld [vmem:[%s1152_s6 + $0x18] sm:$0xff]  ;;  %v1005_v21 = vld [vmem:[%s1152_s6 + $0x10] sm:$0xff] }
  0x1b   : > { %610 = vmatpush.bf16.msra.mxu0 %v1009_v5  ;;  %v1015_v14 = vld [vmem:[%s1152_s6 + $0x60] sm:$0xff]  ;;  %v1014_v18 = vld [vmem:[%s1152_s6 + $0x58] sm:$0xff]  ;;  %v1013_v22 = vld [vmem:[%s1152_s6 + $0x50] sm:$0xff] }
  0x1c   : > { %623 = vmatpush.bf16.msra.mxu1 %v1017_v6  ;;  %v1023_v15 = vld [vmem:[%s1152_s6 + $0xa0] sm:$0xff]  ;;  %v1022_v19 = vld [vmem:[%s1152_s6 + $0x98] sm:$0xff]  ;;  %v1021_v23 = vld [vmem:[%s1152_s6 + $0x90] sm:$0xff] }
  0x1d   : > { %636 = vmatpush.bf16.msra.mxu2 %v1025_v7  ;;  %v1031_v16 = vld [vmem:[%s1152_s6 + $0xe0] sm:$0xff]  ;;  %v1030_v20 = vld [vmem:[%s1152_s6 + $0xd8] sm:$0xff]  ;;  %v1029_v24 = vld [vmem:[%s1152_s6 + $0xd0] sm:$0xff] }
  0x1e   : > { %649 = vmatpush.bf16.msra.mxu3 %v1033_v8  ;;  %v1004_v25 = vld [vmem:[%s1152_s6 + $0x8] sm:$0xff]  ;;  %v337_v27 = vld [vmem:[%s1147_s27] sm:$0xff] }
  0x1f   : > { %611 = vmatpush.bf16.msra.mxu0 %v1008_v9  ;;  %v1012_v26 = vld [vmem:[%s1152_s6 + $0x48] sm:$0xff]  ;;  %v405_v31 = vunpack.c.l.b16 %v337_v27  ;;  %v406_v32 = vunpack.c.h.b16 %v337_v27  ;;  %v1003_v33 = vld [vmem:[%s1152_s6] sm:$0xff] }
  0x20   : > { %624 = vmatpush.bf16.msra.mxu1 %v1016_v10  ;;  %v1020_v28 = vld [vmem:[%s1152_s6 + $0x88] sm:$0xff]  ;;  %v1011_v34 = vld [vmem:[%s1152_s6 + $0x40] sm:$0xff] }
  0x21   : > { %637 = vmatpush.bf16.msra.mxu2 %v1024_v11  ;;  %v1028_v29 = vld [vmem:[%s1152_s6 + $0xc8] sm:$0xff]  ;;  %v1019_v37 = vld [vmem:[%s1152_s6 + $0x80] sm:$0xff]  ;;  %v409_v39 = vpack.c.b16 %v405_v31, %v405_v31  ;;  %v410_v40 = vpack.c.b16 %v406_v32, %v406_v32 }
  0x22   : > { %650 = vmatpush.bf16.msra.mxu3 %v1032_v12  ;;  %v338_v30 = vld [vmem:[%s1147_s27 + $0x8] sm:$0xff]  ;;  %v1027_v38 = vld [vmem:[%s1152_s6 + $0xc0] sm:$0xff] }
  0x23   : > { %612 = vmatpush.bf16.msra.mxu0 %v1007_v13  ;;  %v407_v35 = vunpack.c.l.b16 %v338_v30  ;;  %v408_v36 = vunpack.c.h.b16 %v338_v30  ;;  %v336_v51 = vld [vmem:[#allocation2] sm:$0xff] }
  0x24   : > { %625 = vmatpush.bf16.msra.mxu1 %v1015_v14 }
  0x25   : > { %638 = vmatpush.bf16.msra.mxu2 %v1023_v15  ;;  %v411_v41 = vpack.c.b16 %v407_v35, %v407_v35  ;;  %v412_v42 = vpack.c.b16 %v408_v36, %v408_v36 }
  0x26   : > { %651 = vmatpush.bf16.msra.mxu3 %v1031_v16 }
  0x27   : > { %613 = vmatpush.bf16.msra.mxu0 %v1006_v17 }
  0x28   : > { %626 = vmatpush.bf16.msra.mxu1 %v1014_v18 }
  0x29   : > { %639 = vmatpush.bf16.msra.mxu2 %v1022_v19 }
  0x2a   : > { %652 = vmatpush.bf16.msra.mxu3 %v1030_v20 }
  0x2b   : > { %614 = vmatpush.bf16.msra.mxu0 %v1005_v21 }
  0x2c   : > { %627 = vmatpush.bf16.msra.mxu1 %v1013_v22 }
  0x2d   : > { %640 = vmatpush.bf16.msra.mxu2 %v1021_v23 }
  0x2e   : > { %653 = vmatpush.bf16.msra.mxu3 %v1029_v24 }
  0x2f   : > { %615 = vmatpush.bf16.msra.mxu0 %v1004_v25 }
  0x30   : > { %628 = vmatpush.bf16.msra.mxu1 %v1012_v26 }
  0x31   : > { %641 = vmatpush.bf16.msra.mxu2 %v1020_v28 }
  0x32   : > { %654 = vmatpush.bf16.msra.mxu3 %v1028_v29 }
  0x33   : > { %616 = vmatpush.bf16.msra.mxu0 %v1003_v33 }
  0x34   : > { %629 = vmatpush.bf16.msra.mxu1 %v1011_v34 }
  0x35   : > { %642 = vmatpush.bf16.msra.mxu2 %v1019_v37 }
  0x36   : > { %655 = vmatpush.bf16.msra.mxu3 %v1027_v38  ;;  %617 = vmatmul.bf16.vlgmr.msra.gmra.mxu0 %v409_v39 }
  0x37   : > { %630 = vmatmul.bf16.vlgmr.msra.gmra.mxu1 %v410_v40 }
  0x38   : > { %643 = vmatmul.bf16.vlgmr.msra.gmra.mxu2 %v411_v41 }
  0x39   : > { %656 = vmatmul.bf16.vlgmr.msra.gmra.mxu3 %v412_v42 }
  0xb3   : > { %v618_v43 = vpop.f32.mrf.mxu0 }
  0xb4   : > { %v631_v44 = vpop.f32.mrf.mxu1 }
  0xb5   : > { %v632_v45 = vadd.f32 %v631_v44, %v618_v43 }
  0xbb   : > { %v644_v46 = vpop.f32.mrf.mxu2  ;;  %v620_v49 = vpop.f32.mrf.mxu0 }
  0xbc   : > { %v657_v47 = vpop.f32.mrf.mxu3  ;;  %v645_v48 = vadd.f32 %v644_v46, %v632_v45  ;;  %v633_v50 = vpop.f32.mrf.mxu1 }
  0xbe   : > { %v658_v52 = vadd.f32 %v657_v47, %v645_v48 }
  0xc0   : > { %v661_v53 = vadd.f32 %v658_v52, %v336_v51  ;;  %667 = sbr.rel (!%p330_p6) target bundleno = 197 (0xc5), region = 40 }
  0xc2   : > { %662 = vst [vmem:[#allocation2] sm:$0xff] %v661_v53 }
  0xc3   : > { %v646_v54 = vpop.f32.mrf.mxu2 }
  0xc4   : > { %v659_v55 = vpop.f32.mrf.mxu3 }
  0xc5 PF: > { %p996_p8 = scmp.ne.s32.totalorder %s1078_s18, 1 }
  0xc7   : > { %672 = sbr.rel (%p996_p8) target bundleno = 229 (0xe5), region = 44 }
  0xcc   : > { %v673_v57 = vld [vmem:[#allocation2] sm:$0xff]  ;;  %v680_v59 = vlaneseq  ;;  %v1090_v62 = vmov 0.0  }
  0xcd   : > { %v1063_v58 = vld [vmem:[%s1227_s2] ss:$0 sm:$0xff] }
  0xce   : > { %v678_v60 = vadd.f32 %v1063_v58, %v673_v57  ;;  %v681_v61 = vshrl.u32 %v680_v59, 7  ;;  %v689_v11 = vld [vmem:[%s1229_s4] sm:$0x1] }
  0xcf   : > { %v698_v14 = vld [vmem:[%s1230_s5] sm:$0x1] }
  0xd0   : > { %679 = vst [vmem:[%s1228_s3] sm:$0xff] %v678_v60  ;;  %vm685_vm0 = vcmp.lt.s32.totalorder %v681_v61, 2 }
  0xd1   : > { %v997_v63 = vsel %vm685_vm0, 1.0, %v1090_v62 }
  0xd2   : > { %v688_v0 = vmul.f32 %v997_v63, %v678_v60 }
  0xd4   : > { %v690_v1 = vrot.slane %v688_v0, 4  ;;  %v699_v2 = vmul.f32 %v688_v0, %v688_v0 }
  0xd6   : > { %v691_v3 = vadd.f32 %v690_v1, %v688_v0  ;;  %v700_v4 = vrot.slane %v699_v2, 4 }
  0xd8   : > { %v692_v5 = vrot.slane %v691_v3, 2  ;;  %v701_v6 = vadd.f32 %v700_v4, %v699_v2 }
  0xda   : > { %v693_v7 = vadd.f32 %v692_v5, %v691_v3  ;;  %v702_v8 = vrot.slane %v701_v6, 2 }
  0xdc   : > { %v694_v9 = vrot.slane %v693_v7, 1  ;;  %v703_v10 = vadd.f32 %v702_v8, %v701_v6 }
  0xde   : > { %v695_v12 = vadd.f32 %v694_v9, %v693_v7  ;;  %v704_v13 = vrot.slane %v703_v10, 1 }
  0xe0   : > { %v696_v15 = vadd.f32 %v695_v12, %v689_v11  ;;  %v705_v16 = vadd.f32 %v704_v13, %v703_v10 }
  0xe2   : > { %697 = vst [vmem:[%s1229_s4] sm:$0x1] %v696_v15  ;;  %v706_v17 = vadd.f32 %v705_v16, %v698_v14 }
  0xe4   : > { %707 = vst [vmem:[%s1230_s5] sm:$0x1] %v706_v17 }
  0xe5 PF: > { %s16_s20 = sadd.s32 1, %s1086_s20   ;;  %s1231_s18 = smov %s1082_s19 }
  0xe6   : > { %p13_p9 = scmp.ge.s32.totalorder %s16_s20, 4   ;;  %s1232_s19 = smov %s1234_s21 }
  0xe8   :  { %15 = sbr.rel (!%p13_p9) target bundleno = 2 (0x2), region = 104 }

// kernel: discriminator_forward.14
= control target key start
LH: loop header
LB: loop body
LE: loop exit
PB: predicated region body
PF: predicated region fallthrough
CT: control target
= control target key end

     0   :  { %s113_s1 = inlined_call_operand.vmem [shape: f32[1,128], index: 1, kind: input, shape index: {}]   ;;  %s114_s2 = inlined_call_operand.vmem [shape: f32[1,128], index: 2, kind: input, shape index: {}]   ;;  %s115_s4 = inlined_call_operand.vmem [shape: f32[1,128], index: 4, kind: input, shape index: {}]   ;;  %s116_s0 = inlined_call_operand.vmem [shape: f32[8,128], index: 0, kind: input, shape index: {}]   ;;  %s117_s3 = inlined_call_operand.vmem [shape: f32[1,128], index: 3, kind: input, shape index: {}]   ;;  %s118_s5 = inlined_call_operand.vmem [shape: f32[8,128], index: 5, kind: output, shape index: {}]  }
   0x1   :  { %v20_v0 = vld [vmem:[%s113_s1] sm:$0x1] }
   0x2   :  { %v22_v1 = vld [vmem:[%s114_s2] sm:$0x1]  ;;  %v21_v2 = vmul.f32 0.5, %v20_v0 }
   0x3   :  { %v23_v3 = vmul.f32 0.5, %v22_v1  ;;  %v38_v15 = vld [vmem:[%s117_s3] sm:$0x1] }
   0x4   :  { %v24_v4 = vmul.f32 %v21_v2, %v21_v2  ;;  %v42_v13 = vperm.slane %v21_v2, 0  ;;  %v40_v16 = vld [vmem:[%s116_s0] sm:$0xff] }
   0x5   :  { %v62_v21 = vld [vmem:[%s115_s4] ss:$0 sm:$0xff] }
   0x6   :  { %v25_v5 = vsub.f32 %v23_v3, %v24_v4  ;;  %v44_v19 = vsub.f32 %v40_v16, %v42_v13 }
   0x8   :  { %v26_v6 = vmax.f32 %v25_v5, 0.0 }
   0xa   :  { %v27_v7 = vadd.f32 1e-05, %v26_v6 }
   0xc   :  { %63 = vrsqrt.f32 %v27_v7  ;;  %vm34_vm0 = vweird.f32 %v27_v7 }
  0x12   :  { %v64_v8 = vpop.eup %63 }
  0x13   :  { %v29_v9 = vmul.f32 %v64_v8, %v27_v7  ;;  %vm35_vm1 = vweird.f32 %v64_v8 }
  0x14   :  { %vm36_vm2 = vmor %vm34_vm0, %vm35_vm1 }
  0x15   :  { %v30_v10 = vmul.f32 %v64_v8, %v29_v9 }
  0x17   :  { %v31_v11 = vmul.f32 0.5, %v30_v10 }
  0x19   :  { %v32_v12 = vsub.f32 1.5, %v31_v11 }
  0x1b   :  { %v33_v14 = vmul.f32 %v64_v8, %v32_v12 }
  0x1d   :  { %v37_v17 = vsel %vm36_vm2, %v64_v8, %v33_v14 }
  0x1e   :  { %v39_v18 = vmul.f32 %v38_v15, %v37_v17 }
  0x20   :  { %v46_v20 = vperm.slane %v39_v18, 0 }
  0x22   :  { %v48_v22 = vmul.f32 %v46_v20, %v44_v19 }
  0x24   :  { %v53_v23 = vadd.f32 %v62_v21, %v48_v22 }
  0x26   :  { %vm54_vm3 = vcmp.gt.f32.partialorder %v53_v23, 0.0  ;;  %v55_v24 = vmul.f32 0.2, %v53_v23 }
  0x28   :  { %v56_v25 = vsel %vm54_vm3, %v53_v23, %v55_v24 }
  0x29   :  { %57 = vst [vmem:[%s118_s5] sm:$0xff] %v56_v25 }

// kernel: discriminator_forward.15
= control target key start
LH: loop header
LB: loop body
LE: loop exit
PB: predicated region body
PF: predicated region fallthrough
CT: control target
= control target key end

     0   :  { %s208_s1 = inlined_call_operand.vmem [shape: bf16[128,128], index: 1, kind: input, shape index: {}]   ;;  %s209_s2 = inlined_call_operand.vmem [shape: f32[1,128], index: 2, kind: input, shape index: {}]   ;;  %s210_s0 = inlined_call_operand.vmem [shape: bf16[8,128], index: 0, kind: input, shape index: {}]   ;;  %s211_s3 = inlined_call_operand.vmem [shape: f32[8,128], index: 3, kind: output, shape index: {}]  }
   0x1   :  { %v153_v0 = vld [vmem:[%s208_s1 + $0x38] sm:$0xff]  ;;  %v152_v1 = vld [vmem:[%s208_s1 + $0x30] sm:$0xff]  ;;  %v151_v2 = vld [vmem:[%s208_s1 + $0x28] sm:$0xff] }
   0x2   :  { %85 = vmatpush.bf16.msra.mxu0 %v153_v0  ;;  %v150_v3 = vld [vmem:[%s208_s1 + $0x20] sm:$0xff]  ;;  %v149_v4 = vld [vmem:[%s208_s1 + $0x18] sm:$0xff]  ;;  %v148_v5 = vld [vmem:[%s208_s1 + $0x10] sm:$0xff] }
   0x3   :  { %v147_v6 = vld [vmem:[%s208_s1 + $0x8] sm:$0xff]  ;;  %v146_v7 = vld [vmem:[%s208_s1] sm:$0xff] }
   0x4   :  { %v20_v8 = vld [vmem:[%s210_s0] sm:$0xf] }
   0x5   :  { %v154_v9 = vld [vmem:[%s209_s2] ss:$0 sm:$0xff] }
   0x6   :  { %86 = vmatpush.bf16.msra.mxu0 %v152_v1 }
   0xa   :  { %87 = vmatpush.bf16.msra.mxu0 %v151_v2 }
   0xe   :  { %88 = vmatpush.bf16.msra.mxu0 %v150_v3 }
  0x12   :  { %89 = vmatpush.bf16.msra.mxu0 %v149_v4 }
  0x16   :  { %90 = vmatpush.bf16.msra.mxu0 %v148_v5 }
  0x1a   :  { %91 = vmatpush.bf16.msra.mxu0 %v147_v6 }
  0x1e   :  { %92 = vmatpush.bf16.msra.mxu0 %v146_v7 }
  0x21   :  { %93 = vmatmul.bf16.vlgmr.msra.gmra.mxu0 %v20_v8 }
  0x9e   :  { %v94_v10 = vpop.f32.mrf.mxu0 }
  0x9f   :  { %v108_v11 = vadd.f32 %v154_v9, %v94_v10 }
  0xa1   :  { %109 = vst [vmem:[%s211_s3] sm:$0xff] %v108_v11 }
  0xa6   :  { %v96_v12 = vpop.f32.mrf.mxu0 }

</bundles_post_ra>
